<compile_context>
chip_gen: v5e
topology: v5e:2x2
jax: 0.10.0
libtpu: 0.0.40
codegen_flags: <defaults>
</compile_context>

<pallas_src>
import functools

import jax
import jax.numpy as jnp
from jax.experimental import pallas as pl
from jax.experimental.pallas import tpu as pltpu


def _round_up(x: int, m: int) -> int:
    return ((x + m - 1) // m) * m


# Max packed rows per grid step.  At 4096 rows the f32 output block is 2 MiB
# (bf16: 1 MiB) and the lane-padded input block 2 MiB; double-buffered total
# stays under v5e's 16 MiB scoped-VMEM default.
_MAX_TILE_ROWS = 4096

# Extra sublane-aligned rows appended to the projection constant to carry the
# progressive mask (row _k_rows), so freq/phase/mask travel as ONE operand.
_MASK_ROWS = 8


def _num_tensorcores() -> int:
    """Best-effort TensorCore count (v7x has 2 per chip); falls back to 1."""
    try:
        info = pltpu.get_tpu_info()
    except Exception:
        return 1
    for attr in ("num_cores", "core_count", "num_tensorcores", "tensorcore_count"):
        v = getattr(info, attr, None)
        if isinstance(v, int) and v > 0:
            return v
    return 1


def _choose_tile_rows(rows: int, n_cores: int) -> int:
    """Large tiles amortize the ~0.35us per-step overhead; on multi-core chips
    aim for >= 2 grid steps per core so each core can double-buffer."""
    rows = max(rows, 1)
    min_steps = 2 * n_cores if n_cores > 1 else 1
    target = -(-rows // min_steps)
    return max(8, min(_MAX_TILE_ROWS, _round_up(target, 8)))


# ----------------------------------------------------------------------------
# Pallas kernel
#   pos_ref  : (TR, K)        f32  pack points per row: [x0,y0,z0,...,x_{p-1},y_{p-1},z_{p-1},1,0..]
#   const_ref: (K+8, pack*C)  f32  rows 0..K-1 = block-diagonal freq + phase row,
#                                  row K = progressive mask (tiled per group)
#   out_ref  : (TR, pack*C)        lane-dense output tile (pack*C == 128 typically)
# ----------------------------------------------------------------------------
def _progressive_encoding_kernel(pos_ref, const_ref, out_ref, *, k_rows):
    proj_mat = const_ref[0:k_rows, :]             # (K, pack*C) block-diagonal + phase
    mask = const_ref[k_rows:k_rows + 1, :]        # (1, pack*C) progressive weights
    # MXU does projection + phase-add + lane placement in one shot.  HIGHEST
    # precision keeps ~f32 accuracy for sin arguments up to ~1e3.
    proj = jnp.dot(
        pos_ref[...],
        proj_mat,
        preferred_element_type=jnp.float32,
        precision=jax.lax.Precision.HIGHEST,
    )
    out_ref[...] = (jnp.sin(proj) * mask).astype(out_ref.dtype)


def _run_kernel(pos_packed, const, *, tile_rows, out_dtype):
    rows, k = pos_packed.shape
    const_rows, out_cols = const.shape
    k_rows = const_rows - _MASK_ROWS
    grid = (rows // tile_rows,)
    kernel = functools.partial(_progressive_encoding_kernel, k_rows=k_rows)
    return pl.pallas_call(
        kernel,
        out_shape=jax.ShapeDtypeStruct((rows, out_cols), out_dtype),
        grid_spec=pltpu.PrefetchScalarGridSpec(
            num_scalar_prefetch=0,
            grid=grid,
            in_specs=[
                pl.BlockSpec((tile_rows, k), lambda i: (i, 0)),
                pl.BlockSpec((const_rows, out_cols), lambda i: (0, 0)),  # resident
            ],
            out_specs=pl.BlockSpec((tile_rows, out_cols), lambda i: (i, 0)),
        ),
        compiler_params=pltpu.CompilerParams(
            dimension_semantics=("parallel",),   # shards steps across v7x's 2 TCs
        ),
    )(pos_packed, const)


# Jitted wrapper: pad -> pack -> pallas -> unpack -> slice in one XLA program,
# so the per-call launch overhead is one dispatch.
@functools.partial(jax.jit, static_argnames=("tile_rows", "pack", "out_dtype"))
def _encode(positions, const, *, tile_rows, pack, out_dtype):
    n = positions.shape[0]
    k_rows = const.shape[0] - _MASK_ROWS
    c = const.shape[1] // pack
    rows = -(-n // pack)
    rows_pad = _round_up(rows, tile_rows)
    n_pad = rows_pad * pack
    pos = positions.astype(jnp.float32)
    if n_pad != n:
        # Padded rows compute finite garbage that is sliced off below.
        pos = jnp.pad(pos, ((0, n_pad - n), (0, 0)))
    pos_grp = pos.reshape(rows_pad, 3 * pack)            # pack points per row
    # Constant-1 column feeds the phase row of the projection matrix; the rest
    # pads K up to a sublane multiple (3*pack + 1 -> 16 for pack=4).
    extra = jnp.zeros((rows_pad, k_rows - 3 * pack), jnp.float32).at[:, 0].set(1.0)
    pos_packed = jnp.concatenate([pos_grp, extra], axis=1)   # (rows_pad, K)
    out = _run_kernel(pos_packed, const, tile_rows=tile_rows, out_dtype=out_dtype)
    out = out.reshape(n_pad, c)
    return out[:n] if n_pad != n else out


# ----------------------------------------------------------------------------
# Python-side module mirroring ProgressiveEncoding's scheduler / weight logic.
# ----------------------------------------------------------------------------
class ProgressiveEncoding:
    def __init__(
        self,
        n_levels: int = 16,
        n_levels_init: int = 1,
        n_features_per_level: int = 2,
        n_scheduler_steps: int = 10000,
        seed: int = 0,
        out_dtype=jnp.bfloat16,      # bf16 halves writeback; use jnp.float32 if needed
        growth_factor: float = 1.4,  # tcnn-like geometric per-level scale
    ):
        self.n_levels = n_levels
        self.n_levels_init = n_levels if n_scheduler_steps == -1 else n_levels_init
        self.n_features_per_level = n_features_per_level
        self.n_output_dims = n_levels * n_features_per_level
        self.n_scheduler_steps = n_scheduler_steps
        self.step_size = (
            n_scheduler_steps // n_levels if n_scheduler_steps != -1 else 1
        )
        self.cur_iter = 0
        self.cur_level = -1
        self.training = True
        self.out_dtype = out_dtype
        self._n_cores = _num_tensorcores()

        c = self.n_output_dims
        # Lane-dense packing factor: pack P consecutive points per 128-lane row.
        # (If 128 % C != 0 this falls back to 1 -> correct but masked stores.)
        self.pack = 128 // c if (c <= 128 and 128 % c == 0) else 1
        self.k_rows = _round_up(3 * self.pack + 1, 8)   # packed-K, sublane aligned

        # weights: (n_levels, n_features_per_level), first n_levels_init rows = 1.
        w = jnp.zeros((n_levels, n_features_per_level), dtype=jnp.float32)
        w = w.at[: self.n_levels_init, :].set(1.0)
        self.weights = w
        self._w_flat = w.reshape(1, -1)                         # weights.view(-1)
        self._ones_flat = jnp.ones((1, c), dtype=jnp.float32)

        # Deterministic multi-resolution frequency bank (stand-in encoding).
        key = jax.random.PRNGKey(seed)
        dirs = jax.random.normal(key, (3, n_levels), dtype=jnp.float32)
        dirs = dirs / jnp.linalg.norm(dirs, axis=0, keepdims=True)
        scales = (2.0 * jnp.pi) * (
            growth_factor ** jnp.arange(n_levels, dtype=jnp.float32)
        )
        level_freq = dirs * scales[None, :]                               # (3, L)
        # Columns 2l and 2l+1 share a frequency; phase pi/2 turns the odd
        # columns into cosines: sin(x + pi/2) == cos(x).
        self.freq = jnp.repeat(level_freq, n_features_per_level, axis=1)  # (3, C)
        phase_per_feat = (jnp.pi / 2.0) * jnp.arange(
            n_features_per_level, dtype=jnp.float32
        )
        self.phase = jnp.tile(phase_per_feat, n_levels)[None, :]          # (1, C)

        # Block-diagonal projection constant: for each packed group g, the
        # (3, C) frequency block lands at rows 3g..3g+2, lanes g*C..(g+1)*C;
        # row 3*pack (fed by the constant-1 input column) carries the phase.
        base = jnp.zeros((self.k_rows + _MASK_ROWS, self.pack * c), jnp.float32)
        for g in range(self.pack):
            base = base.at[3 * g:3 * g + 3, g * c:(g + 1) * c].set(self.freq)
            base = base.at[3 * self.pack, g * c:(g + 1) * c].set(self.phase[0])
        self._proj_base = base
        self._const = self._with_mask(self._w_flat)
        self._const_all_on = self._with_mask(self._ones_flat)

    def _with_mask(self, w_flat):
        """Combined constant = projection rows + progressive-mask row."""
        return self._proj_base.at[self.k_rows, :].set(jnp.tile(w_flat[0], self.pack))

    def __call__(self, positions):
        n, d = positions.shape
        assert d == 3
        rows = -(-n // self.pack)
        tile_rows = _choose_tile_rows(rows, self._n_cores)

        if self.n_scheduler_steps == -1:
            return _encode(positions, self._const_all_on,
                           tile_rows=tile_rows, pack=self.pack,
                           out_dtype=self.out_dtype)

        cur_level = min(
            int(self.cur_iter // self.step_size) + self.n_levels_init - 1,
            self.n_levels - 1,
        )
        if self.cur_level != cur_level:
            self.cur_level = cur_level
            self.weights = self.weights.at[cur_level, :].set(1.0)
            self._w_flat = self.weights.reshape(1, -1)
            self._const = self._with_mask(self._w_flat)

        out = _encode(positions, self._const,
                      tile_rows=tile_rows, pack=self.pack,
                      out_dtype=self.out_dtype)
        if self.training:
            self.cur_iter += 1
        return out


# ----------------------------------------------------------------------------
# Pure-JAX reference for correctness checking (same math, no Pallas).
# ----------------------------------------------------------------------------
def _reference(positions, freq, phase, weights_flat):
    p = positions.astype(jnp.float32)
    proj = (p[:, 0:1] * freq[0:1, :]
            + p[:, 1:2] * freq[1:2, :]
            + p[:, 2:3] * freq[2:3, :])
    return jnp.sin(proj + phase) * weights_flat


if __name__ == "__main__":
    key = jax.random.PRNGKey(0)
    n_points = 256
    positions = jax.random.uniform(key, (n_points, 3), dtype=jnp.float32)

    enc = ProgressiveEncoding(
        n_levels=16, n_levels_init=1, n_features_per_level=2, n_scheduler_steps=10000
    )

    out = jax.block_until_ready(enc(positions))
    assert out.shape == (n_points, enc.n_output_dims)
    assert out.dtype == jnp.bfloat16

    ref = _reference(positions, enc.freq, enc.phase, enc._w_flat)
    # bf16 output quantization (~4e-3) + MXU-vs-FMA projection rounding on
    # sin arguments up to ~1e3 -> 2e-2 tolerance.
    assert jnp.allclose(out.astype(jnp.float32), ref, atol=2e-2, rtol=2e-2)
    # Disabled levels must be exactly zero (masked by the progressive weights).
    lead = enc.n_levels_init * enc.n_features_per_level
    assert float(jnp.abs(out[:, lead:].astype(jnp.float32)).max()) == 0.0

    # Advance the scheduler far enough to unlock more levels and run again.
    enc.cur_iter = 5 * enc.step_size
    out2 = jax.block_until_ready(enc(positions))
    ref2 = _reference(positions, enc.freq, enc.phase, enc._w_flat)
    assert jnp.allclose(out2.astype(jnp.float32), ref2, atol=2e-2, rtol=2e-2)

    # Ragged (non-tile-multiple) batch exercises the pad / slice path.
    out3 = jax.block_until_ready(enc(positions[:100]))
    assert out3.shape == (100, enc.n_output_dims)
    assert jnp.allclose(out3.astype(jnp.float32), ref2[:100], atol=2e-2, rtol=2e-2)

    # f32 output path with a tight tolerance (HIGHEST-precision MXU projection).
    enc32 = ProgressiveEncoding(
        n_levels=16, n_levels_init=1, n_features_per_level=2,
        n_scheduler_steps=10000, out_dtype=jnp.float32,
    )
    out4 = jax.block_until_ready(enc32(positions))
    ref4 = _reference(positions, enc32.freq, enc32.phase, enc32._w_flat)
    assert out4.dtype == jnp.float32
    assert jnp.allclose(out4, ref4, atol=5e-3, rtol=5e-3)

    print("KERNEL_OK")
</pallas_src>

<mosaic_0001>
module attributes {stable_mosaic.version = 11 : i64} {
  func.func @_progressive_encoding_kernel(%arg0: i32, %arg1: memref<64x16xf32, #tpu.memory_space<vmem>>, %arg2: memref<24x128xf32, #tpu.memory_space<vmem>>, %arg3: memref<64x128xbf16, #tpu.memory_space<vmem>>) attributes {dimension_semantics = [#tpu.dimension_semantics<parallel>], iteration_bounds = array<i64: 1>, scalar_prefetch = 0 : i64, scratch_operands = 0 : i64, tpu.core_type = #tpu.core_type<tc>, window_params = [{transform_indices = @transform_0, window_bounds = array<i64: 64, 16>}, {pipeline_mode = #tpu.pipeline_mode<synchronous>, transform_indices = @transform_1, window_bounds = array<i64: 24, 128>}, {transform_indices = @transform_2, window_bounds = array<i64: 64, 128>}]} {
    %c0 = arith.constant 0 : index
    %c0_0 = arith.constant 0 : index
    %0 = vector.load %arg2[%c0, %c0_0] : memref<24x128xf32, #tpu.memory_space<vmem>>, vector<16x128xf32>
    %c16 = arith.constant 16 : index
    %c0_1 = arith.constant 0 : index
    %1 = vector.load %arg2[%c16, %c0_1] : memref<24x128xf32, #tpu.memory_space<vmem>>, vector<1x128xf32>
    %c0_2 = arith.constant 0 : index
    %c0_3 = arith.constant 0 : index
    %2 = vector.load %arg1[%c0_2, %c0_3] : memref<64x16xf32, #tpu.memory_space<vmem>>, vector<64x16xf32>
    %cst = arith.constant dense<0.000000e+00> : vector<64x128xf32>
    %3 = tpu.matmul %2, %0, %cst {dimension_numbers = #tpu.dot_dimension_numbers<[1], [0], [0], [1], [0, 0, 1, 1], [], []>, precision = #tpu.contract_precision<fp32>} : vector<64x16xf32>, vector<16x128xf32>, vector<64x128xf32> -> vector<64x128xf32>
    %4 = math.sin %3 : vector<64x128xf32>
    %5 = vector.broadcast %1 : vector<1x128xf32> to vector<64x128xf32>
    %6 = arith.mulf %4, %5 : vector<64x128xf32>
    %7 = arith.truncf %6 : vector<64x128xf32> to vector<64x128xbf16>
    %c0_4 = arith.constant 0 : index
    %c0_5 = arith.constant 0 : index
    %8 = vector.load %arg3[%c0_4, %c0_5] : memref<64x128xbf16, #tpu.memory_space<vmem>>, vector<64x128xbf16>
    tpu.vector_store %arg3[%c0_4, %c0_5], %7 {strides = array<i32>} : memref<64x128xbf16, #tpu.memory_space<vmem>>, vector<64x128xbf16>,
    return
  }
  func.func @transform_0(%arg0: i32) -> (i32, i32) {
    %c0_i32 = arith.constant 0 : i32
    %c0_i32_0 = arith.constant 0 : i32
    return %arg0, %c0_i32 : i32, i32
  }
  func.func @transform_1(%arg0: i32) -> (i32, i32) {
    %c0_i32 = arith.constant 0 : i32
    %c0_i32_0 = arith.constant 0 : i32
    %c0_i32_1 = arith.constant 0 : i32
    return %c0_i32, %c0_i32_0 : i32, i32
  }
  func.func @transform_2(%arg0: i32) -> (i32, i32) {
    %c0_i32 = arith.constant 0 : i32
    %c0_i32_0 = arith.constant 0 : i32
    return %arg0, %c0_i32 : i32, i32
  }
}

</mosaic_0001>

<bundles_post_ra>
// kernel: _encode.1
= control target key start
LH: loop header
LB: loop body
LE: loop exit
PB: predicated region body
PF: predicated region fallthrough
CT: control target
= control target key end

     0   :  { %vm22_vm0 = vcmask 130048   ;;  %s2848_s1 = inlined_call_operand.vmem [shape: f32[24,128], index: 1, kind: input, shape index: {}]   ;;  %s2849_s0 = inlined_call_operand.vmem [shape: f32[64,16], index: 0, kind: input, shape index: {}]   ;;  %s2850_s2 = inlined_call_operand.vmem [shape: bf16[64,128], index: 2, kind: output, shape index: {}]  }
   0x1   :  { %v12_v0 = vld [vmem:[%s2848_s1 + $0x8] sm:$0xff]  ;;  %v11_v2 = vld [vmem:[%s2848_s1] sm:$0xff]  ;;  %v20_v14 = vld [vmem:[%s2849_s0 + $0x30] sm:$0xff] }
   0x2   :  { %v1777_v1 = vand.u32 4294901760, %v12_v0  ;;  %v18_v3 = vld [vmem:[%s2849_s0 + $0x20] sm:$0xff]  ;;  %v19_v4 = vld [vmem:[%s2849_s0 + $0x28] sm:$0xff]  ;;  %v1788_v5 = vand.u32 4294901760, %v11_v2  ;;  %v42_v23 = vsel %vm22_vm0, %v20_v14, 0  ;;  %v16_v30 = vld [vmem:[%s2849_s0 + $0x10] sm:$0xff] }
   0x3   :  { %v36_v6 = vsel %vm22_vm0, %v18_v3, 0  ;;  %v39_v7 = vsel %vm22_vm0, %v19_v4, 0  ;;  %v14_v8 = vld [vmem:[%s2849_s0] sm:$0xff]  ;;  %v15_v9 = vld [vmem:[%s2849_s0 + $0x8] sm:$0xff]  ;;  %v1839_v34 = vand.u32 4294901760, %v42_v23  ;;  %v21_v39 = vld [vmem:[%s2849_s0 + $0x38] sm:$0xff] }
   0x4   :  { %1739 = vmatpush.msra.mxu2 %v1777_v1  ;;  %v145_v10 = vsub.f32 %v12_v0, %v1777_v1  ;;  %v1800_v11 = vand.u32 4294901760, %v36_v6  ;;  %62 = vmatpush.msra.mxu0 %v1777_v1  ;;  %v1803_v12 = vand.u32 4294901760, %v39_v7  ;;  %v24_v13 = vsel %vm22_vm0, %v14_v8, 0  ;;  %v17_v45 = vld [vmem:[%s2849_s0 + $0x18] sm:$0xff] }
   0x5   :  { %v151_v15 = vsub.f32 %v11_v2, %v1788_v5  ;;  %v1810_v16 = vand.u32 4294901760, %v24_v13  ;;  %v27_v17 = vsel %vm22_vm0, %v15_v9, 0  ;;  %v30_v40 = vsel %vm22_vm0, %v16_v30, 0 }
   0x6   :  { %1740 = vmatpush.msra.mxu2 %v1788_v5  ;;  %v146_v18 = vand.u32 4294901760, %v145_v10  ;;  %v1815_v19 = vsub.f32 %v36_v6, %v1800_v11  ;;  %v1818_v20 = vsub.f32 %v39_v7, %v1803_v12  ;;  %64 = vmatpush.msra.mxu0 %v1788_v5  ;;  %v1825_v24 = vand.u32 4294901760, %v27_v17 }
   0x7   :  { %v152_v21 = vand.u32 4294901760, %v151_v15  ;;  %v1822_v22 = vsub.f32 %v24_v13, %v1810_v16  ;;  %v81_v42 = vand.u32 4294901760, %v30_v40  ;;  %v1853_v44 = vsub.f32 %v42_v23, %v1839_v34 }
   0x8   :  { %205 = vmatpush.msrb.mxu2 %v145_v10  ;;  %v147_v25 = vsub.f32 %v145_v10, %v146_v18  ;;  %v99_v26 = vand.u32 4294901760, %v1815_v19  ;;  %334 = vmatpush.msrb.mxu0 %v146_v18  ;;  %v1830_v29 = vsub.f32 %v27_v17, %v1825_v24  ;;  %v107_v33 = vand.u32 4294901760, %v1818_v20 }
   0x9   :  { %v153_v27 = vsub.f32 %v151_v15, %v152_v21  ;;  %v67_v28 = vand.u32 4294901760, %v1822_v22  ;;  %v45_v46 = vsel %vm22_vm0, %v21_v39, 0  ;;  %v82_v48 = vsub.f32 %v30_v40, %v81_v42 }
   0xa   :  { %208 = vmatpush.msrb.mxu2 %v151_v15  ;;  %v148_v31 = vand.u32 4294901760, %v147_v25  ;;  %v100_v32 = vsub.f32 %v1815_v19, %v99_v26  ;;  %338 = vmatpush.msrb.mxu0 %v152_v21  ;;  %v75_v38 = vand.u32 4294901760, %v1830_v29  ;;  %v108_v43 = vsub.f32 %v1818_v20, %v107_v33 }
   0xb   :  { %v154_v35 = vand.u32 4294901760, %v153_v27  ;;  %v68_v36 = vsub.f32 %v1822_v22, %v67_v28  ;;  %v33_v49 = vsel %vm22_vm0, %v17_v45, 0  ;;  %v115_v51 = vand.u32 4294901760, %v1853_v44 }
   0xc   :  { %1741 = vmatpush.msra.mxu3 %v148_v31  ;;  %v101_v37 = vand.u32 4294901760, %v100_v32  ;;  %149 = vmatpush.msra.mxu1 %v148_v31  ;;  %v76_v47 = vsub.f32 %v1830_v29, %v75_v38  ;;  %v109_v50 = vand.u32 4294901760, %v108_v43  ;;  %v121_v52 = vand.u32 4294901760, %v45_v46 }
   0xd   :  { %v69_v41 = vand.u32 4294901760, %v68_v36  ;;  %v83_v54 = vand.u32 4294901760, %v82_v48  ;;  %v89_v55 = vand.u32 4294901760, %v33_v49  ;;  %v116_v56 = vsub.f32 %v1853_v44, %v115_v51 }
   0xe   :  { %102 = vmatmul.f32.vlgmr.msra.gmra.mxu2 %v101_v37  ;;  %1742 = vmatpush.msra.mxu3 %v154_v35  ;;  %v77_v53 = vand.u32 4294901760, %v76_v47  ;;  %v122_v57 = vsub.f32 %v45_v46, %v121_v52 }
   0xf   :  { %173 = vmatmul.f32.vlgmr.msra.gmra.mxu3 %v1800_v11  ;;  %155 = vmatpush.msra.mxu1 %v154_v35  ;;  %v84_v58 = vsub.f32 %v82_v48, %v83_v54  ;;  %v90_v59 = vsub.f32 %v33_v49, %v89_v55  ;;  %v117_v60 = vand.u32 4294901760, %v116_v56 }
  0x10   :  { %265 = vmatpush.msrb.mxu3 %v1777_v1  ;;  %70 = vmatmul.f32.vlgmr.msra.gmra.mxu0 %v69_v41  ;;  %v123_v61 = vand.u32 4294901760, %v122_v57 }
  0x11   :  { %157 = vmatmul.f32.vlgmr.msra.gmra.mxu1 %v1810_v16  ;;  %v85_v62 = vand.u32 4294901760, %v84_v58  ;;  %v91_v63 = vand.u32 4294901760, %v90_v59 }
  0x12   :  { %387 = vmatpush.msrb.mxu1 %v1777_v1  ;;  %267 = vmatpush.msrb.mxu3 %v1788_v5  ;;  %v124_v0 = vsub.f32 %v122_v57, %v123_v61 }
  0x13   :  { %v92_v1 = vsub.f32 %v90_v59, %v91_v63 }
  0x14   :  { %389 = vmatpush.msrb.mxu1 %v1788_v5  ;;  %v125_v2 = vand.u32 4294901760, %v124_v0 }
  0x15   :  { %v93_v3 = vand.u32 4294901760, %v92_v1  ;;  %v1753_v1 = vmov 2475754826  }
  0x16   :  { %110 = vmatmul.f32.gmra.mxu2 %v109_v50 }
  0x17   :  { %177 = vmatmul.f32.gmra.mxu3 %v1803_v12 }
  0x18   :  { %78 = vmatmul.f32.gmra.mxu0 %v77_v53 }
  0x19   :  { %161 = vmatmul.f32.gmra.mxu1 %v1825_v24 }
  0x1e   :  { %118 = vmatmul.f32.gmra.mxu2 %v117_v60 }
  0x1f   :  { %181 = vmatmul.f32.gmra.mxu3 %v1839_v34 }
  0x20   :  { %86 = vmatmul.f32.gmra.mxu0 %v85_v62 }
  0x21   :  { %165 = vmatmul.f32.gmra.mxu1 %v81_v42 }
  0x26   :  { %126 = vmatmul.f32.gmra.mxu2 %v125_v2 }
  0x27   :  { %185 = vmatmul.f32.gmra.mxu3 %v121_v52 }
  0x28   :  { %94 = vmatmul.f32.gmra.mxu0 %v93_v3 }
  0x29   :  { %169 = vmatmul.f32.gmra.mxu1 %v89_v55 }
  0x2e   :  { %211 = vmatmul.f32.vlgmr.msrb.gmra.mxu2 %v1822_v22 }
  0x2f   :  { %271 = vmatmul.f32.vlgmr.msrb.gmra.mxu3 %v67_v28 }
  0x30   :  { %340 = vmatmul.f32.vlgmr.msrb.gmra.mxu0 %v1810_v16 }
  0x31   :  { %391 = vmatmul.f32.vlgmr.msrb.gmra.mxu1 %v1810_v16 }
  0x36   :  { %216 = vmatmul.f32.gmra.mxu2 %v1830_v29 }
  0x37   :  { %277 = vmatmul.f32.gmra.mxu3 %v75_v38 }
  0x38   :  { %344 = vmatmul.f32.gmra.mxu0 %v1825_v24 }
  0x39   :  { %395 = vmatmul.f32.gmra.mxu1 %v1825_v24 }
  0x3e   :  { %221 = vmatmul.f32.gmra.mxu2 %v82_v48 }
  0x3f   :  { %283 = vmatmul.f32.gmra.mxu3 %v83_v54 }
  0x40   :  { %348 = vmatmul.f32.gmra.mxu0 %v81_v42 }
  0x41   :  { %399 = vmatmul.f32.gmra.mxu1 %v81_v42 }
  0x46   :  { %226 = vmatmul.f32.gmra.mxu2 %v90_v59 }
  0x47   :  { %289 = vmatmul.f32.gmra.mxu3 %v91_v63  ;;  %v1752_v63 = vmov 683565275  }
  0x48   :  { %352 = vmatmul.f32.gmra.mxu0 %v89_v55 }
  0x49   :  { %403 = vmatmul.f32.gmra.mxu1 %v89_v55 }
  0x4e   :  { %231 = vmatmul.f32.gmra.mxu2 %v1815_v19 }
  0x4f   :  { %295 = vmatmul.f32.gmra.mxu3 %v99_v26 }
  0x50   :  { %356 = vmatmul.f32.gmra.mxu0 %v1800_v11 }
  0x51   :  { %407 = vmatmul.f32.gmra.mxu1 %v1800_v11 }
  0x56   :  { %236 = vmatmul.f32.gmra.mxu2 %v1818_v20 }
  0x57   :  { %301 = vmatmul.f32.gmra.mxu3 %v107_v33 }
  0x58   :  { %360 = vmatmul.f32.gmra.mxu0 %v1803_v12 }
  0x59   :  { %411 = vmatmul.f32.gmra.mxu1 %v1803_v12 }
  0x5e   :  { %241 = vmatmul.f32.gmra.mxu2 %v1853_v44 }
  0x5f   :  { %307 = vmatmul.f32.gmra.mxu3 %v115_v51 }
  0x60   :  { %364 = vmatmul.f32.gmra.mxu0 %v1839_v34 }
  0x61   :  { %415 = vmatmul.f32.gmra.mxu1 %v1839_v34 }
  0x66   :  { %246 = vmatmul.f32.gmra.mxu2 %v122_v57 }
  0x67   :  { %313 = vmatmul.f32.gmra.mxu3 %v123_v61 }
  0x68   :  { %368 = vmatmul.f32.gmra.mxu0 %v121_v52 }
  0x69   :  { %419 = vmatmul.f32.gmra.mxu1 %v121_v52 }
  0x8d   :  { %v71_v4 = vpop.f32.mrf.mxu0 }
  0x8e   :  { %v158_v5 = vpop.f32.mrf.mxu1 }
  0x8f   :  { %v159_v26 = vadd.f32 %v158_v5, %v71_v4  ;;  %v1754_v5 = vmov 2131351028  }
  0x91   :  { %v103_v6 = vpop.f32.mrf.mxu2 }
  0x92   :  { %v174_v7 = vpop.f32.mrf.mxu3 }
  0x93   :  { %v1893_v8 = vadd.f32 %v174_v7, %v103_v6 }
  0x95   :  { %v79_v9 = vpop.f32.mrf.mxu0 }
  0x96   :  { %v162_v10 = vpop.f32.mrf.mxu1 }
  0x97   :  { %v163_v35 = vadd.f32 %v162_v10, %v79_v9  ;;  %v1755_v9 = vmov 2102212464  }
  0x99   :  { %v111_v11 = vpop.f32.mrf.mxu2 }
  0x9a   :  { %v178_v12 = vpop.f32.mrf.mxu3 }
  0x9b   :  { %v1895_v13 = vadd.f32 %v178_v12, %v111_v11  ;;  %v1756_v12 = vmov 920167782  }
  0x9d   :  { %v87_v14 = vpop.f32.mrf.mxu0 }
  0x9e   :  { %v166_v15 = vpop.f32.mrf.mxu1 }
  0x9f   :  { %v167_v16 = vadd.f32 %v166_v15, %v87_v14 }
  0xa1   :  { %v119_v17 = vpop.f32.mrf.mxu2 }
  0xa2   :  { %v182_v18 = vpop.f32.mrf.mxu3 }
  0xa3   :  { %v1897_v19 = vadd.f32 %v182_v18, %v119_v17 }
  0xa5   :  { %v95_v20 = vpop.f32.mrf.mxu0 }
  0xa6   :  { %v170_v21 = vpop.f32.mrf.mxu1 }
  0xa7   :  { %v1899_v22 = vadd.f32 %v170_v21, %v95_v20 }
  0xa9   :  { %v127_v23 = vpop.f32.mrf.mxu2 }
  0xaa   :  { %v186_v24 = vpop.f32.mrf.mxu3 }
  0xab   :  { %v1901_v25 = vadd.f32 %v186_v24, %v127_v23 }
  0xad   :  { %v341_v30 = vpop.f32.mrf.mxu0 }
  0xae   :  { %v392_v32 = vpop.f32.mrf.mxu1 }
  0xb1   :  { %v212_v27 = vpop.f32.mrf.mxu2 }
  0xb2   :  { %v213_v28 = vadd.f32 %v212_v27, %v159_v26  ;;  %v272_v29 = vpop.f32.mrf.mxu3 }
  0xb4   :  { %v273_v31 = vadd.f32 %v272_v29, %v213_v28 }
  0xb5   :  { %v345_v43 = vpop.f32.mrf.mxu0 }
  0xb6   :  { %v342_v33 = vadd.f32 %v341_v30, %v273_v31  ;;  %v396_v47 = vpop.f32.mrf.mxu1 }
  0xb8   :  { %v1903_v34 = vadd.f32 %v392_v32, %v342_v33 }
  0xb9   :  { %v217_v36 = vpop.f32.mrf.mxu2 }
  0xba   :  { %v423_v37 = vand.u32 2147483647, %v1903_v34  ;;  %v426_v38 = vand.u32 2139095040, %v1903_v34  ;;  %v278_v39 = vpop.f32.mrf.mxu3  ;;  %v218_v40 = vadd.f32 %v217_v36, %v163_v35 }
  0xbc   :  { %v427_v41 = vshrl.u32 %v426_v38, 23  ;;  %v430_v42 = vand.u32 8388607, %v423_v37  ;;  %v279_v44 = vadd.f32 %v278_v39, %v218_v40 }
  0xbe   :  { %v1692_v45 = vadd.s32 4294967169, %v427_v41  ;;  %v431_v46 = vor.u32 8388608, %v430_v42  ;;  %v346_v48 = vadd.f32 %v345_v43, %v279_v44 }
  0xc0   :  { %v433_v49 = vadd.s32 1, %v1692_v45  ;;  %v1909_v50 = vshll.u32 %v431_v46, 8  ;;  %v1911_v51 = vadd.f32 %v396_v47, %v346_v48 }
  0xc1   :  { %v222_v55 = vpop.f32.mrf.mxu2 }
  0xc2   :  { %vm434_vm1 = vcmp.gt.s32.totalorder %v433_v49, 0  ;;  %v578_v53 = vand.u32 2147483647, %v1911_v51  ;;  %v581_v54 = vand.u32 2139095040, %v1911_v51  ;;  %v1916_v57 = vand.u32 65535, %v1909_v50  ;;  %v284_v39 = vpop.f32.mrf.mxu3 }
  0xc3   :  { %v435_v52 = vsel %vm434_vm1, %v433_v49, 0  ;;  %v1919_v59 = vshrl.u32 %v1909_v50, 16  ;;  %v223_v61 = vadd.f32 %v222_v55, %v167_v16  ;;  %v1757_v16 = vmov 1326507024  }
  0xc4   :  { %v437_v56 = vand.u32 31, %v435_v52  ;;  %v582_v60 = vshrl.u32 %v581_v54, 23  ;;  %v436_v62 = vshrl.u32 %v435_v52, 5  ;;  %v1925_v3 = vand.u32 8388607, %v578_v53 }
  0xc5   :  { %v285_v48 = vadd.f32 %v284_v39, %v223_v61 }
  0xc6   :  { %v438_v58 = vsub.s32 32, %v437_v56  ;;  %v440_v0 = vshll.u32 %v1752_v63, %v437_v56  ;;  %v443_v2 = vshll.u32 %v1753_v1, %v437_v56  ;;  %v446_v7 = vshll.u32 %v1754_v5, %v437_v56 }
  0xc7   :  { %v449_v11 = vshll.u32 %v1755_v9, %v437_v56  ;;  %v452_v15 = vshll.u32 %v1756_v12, %v437_v56  ;;  %v1695_v23 = vadd.s32 4294967169, %v582_v60  ;;  %vm455_vm2 = vcmp.lt.s32.totalorder %v436_v62, 1 }
  0xc8   :  { %v441_v4 = vshrl.u32 %v1753_v1, %v438_v58  ;;  %v444_v6 = vshrl.u32 %v1754_v5, %v438_v58  ;;  %v447_v10 = vshrl.u32 %v1755_v9, %v438_v58  ;;  %v450_v14 = vshrl.u32 %v1756_v12, %v438_v58 }
  0xc9   :  { %v453_v17 = vshrl.u32 %v1757_v16, %v438_v58  ;;  %vm458_vm3 = vcmp.lt.s32.totalorder %v436_v62, 4  ;;  %v439_v27 = vshrl.u32 %v1752_v63, %v438_v58  ;;  %vm457_vm4 = vcmp.lt.s32.totalorder %v436_v62, 3 }
  0xca   :  { %v442_v18 = vor.u32 %v441_v4, %v440_v0  ;;  %v445_v20 = vor.u32 %v444_v6, %v443_v2  ;;  %v448_v21 = vor.u32 %v447_v10, %v446_v7  ;;  %v451_v24 = vor.u32 %v450_v14, %v449_v11 }
  0xcb   :  { %v454_v26 = vor.u32 %v453_v17, %v452_v15  ;;  %v588_v33 = vadd.s32 1, %v1695_v23  ;;  %vm456_vm5 = vcmp.lt.s32.totalorder %v436_v62, 2  ;;  %v586_v47 = vor.u32 8388608, %v1925_v3 }
  0xcc   :  { %v460_v28 = vsel %vm458_vm3, %v448_v21, 2102212464  ;;  %v463_v29 = vsel %vm455_vm2, %v442_v18, %v445_v20  ;;  %v467_v30 = vsel %vm455_vm2, %v445_v20, %v448_v21  ;;  %v464_v31 = vsel %vm458_vm3, %v451_v24, 920167782 }
  0xcd   :  { %v468_v32 = vsel %vm458_vm3, %v454_v26, 1326507024  ;;  %v459_v35 = vsel %vm455_vm2, %v439_v27, %v442_v18  ;;  %v465_v36 = vsel %vm457_vm4, %v448_v21, %v464_v31  ;;  %v461_v40 = vsel %vm457_vm4, %v445_v20, %v460_v28 }
  0xce   :  { %v469_v38 = vsel %vm457_vm4, %v451_v24, %v468_v32  ;;  %v466_v41 = vsel %vm456_vm5, %v463_v29, %v465_v36  ;;  %vm589_vm6 = vcmp.gt.s32.totalorder %v588_v33, 0  ;;  %v1937_v49 = vsel %vm456_vm5, %v459_v35, %v461_v40 }
  0xcf   :  { %v470_v42 = vsel %vm456_vm5, %v467_v30, %v469_v38  ;;  %v496_v45 = vand.u32 65535, %v466_v41  ;;  %v497_v46 = vshrl.u32 %v466_v41, 16  ;;  %v590_v55 = vsel %vm589_vm6, %v588_v33, 0 }
  0xd0   :  { %v474_v43 = vand.u32 65535, %v470_v42  ;;  %v475_v44 = vshrl.u32 %v470_v42, 16  ;;  %v592_v15 = vand.u32 31, %v590_v55  ;;  %v1758_v17 = vmov 0   ;;  %v349_v42 = vpop.f32.mrf.mxu0 }
  0xd1   :  { %v499_v60 = vmul.u32 %v497_v46, %v1916_v57  ;;  %v500_v62 = vmul.u32 %v496_v45, %v1919_v59  ;;  %v498_v3 = vmul.u32 %v496_v45, %v1916_v57  ;;  %v501_v61 = vmul.u32 %v497_v46, %v1919_v59 }
  0xd2   :  { %v477_v52 = vmul.u32 %v475_v44, %v1916_v57  ;;  %v478_v54 = vmul.u32 %v474_v43, %v1919_v59  ;;  %v476_v56 = vmul.u32 %v474_v43, %v1916_v57  ;;  %v479_v58 = vmul.u32 %v475_v44, %v1919_v59 }
  0xd3   :  { %v502_v7 = vshll.u32 %v499_v60, 16  ;;  %v503_v10 = vshrl.u32 %v499_v60, 16  ;;  %v504_v14 = vshll.u32 %v500_v62, 16  ;;  %v505_v20 = vshrl.u32 %v500_v62, 16 }
  0xd4   :  { %v480_v0 = vshll.u32 %v477_v52, 16  ;;  %v481_v2 = vshrl.u32 %v477_v52, 16  ;;  %v482_v4 = vshll.u32 %v478_v54, 16  ;;  %v483_v6 = vshrl.u32 %v478_v54, 16 }
  0xd5   :  { %vm506_vm8 = vc.u32 %v498_v3, %v502_v7  ;;  %v508_v21 = vadd.s32 %v502_v7, %v498_v3  ;;  %v1949_v24 = vsub.s32 32, %v592_v15  ;;  %v1952_v27 = vshrl.u32 %v590_v55, 5 }
  0xd6   :  { %vm484_vm7 = vc.u32 %v476_v56, %v480_v0  ;;  %v486_v11 = vadd.s32 %v480_v0, %v476_v56  ;;  %v507_v57 = vsel %vm506_vm8, 1, %v1758_v17  ;;  %v595_v31 = vshll.u32 %v1752_v63, %v592_v15 }
  0xd7   :  { %v485_v18 = vsel %vm484_vm7, 1, %v1758_v17  ;;  %v509_v26 = vadd.s32 %v507_v57, %v501_v61  ;;  %vm510_vm10 = vc.u32 %v508_v21, %v504_v14  ;;  %v1955_v30 = vadd.s32 %v508_v21, %v504_v14 }
  0xd8   :  { %v487_v23 = vadd.s32 %v485_v18, %v479_v58  ;;  %vm488_vm9 = vc.u32 %v486_v11, %v482_v4  ;;  %v511_v29 = vsel %vm510_vm10, 1, %v1758_v17  ;;  %v596_v33 = vshrl.u32 %v1753_v1, %v1949_v24 }
  0xd9   :  { %v489_v59 = vsel %vm488_vm9, 1, %v1758_v17  ;;  %v513_v32 = vadd.s32 %v511_v29, %v509_v26  ;;  %v598_v35 = vshll.u32 %v1753_v1, %v592_v15  ;;  %v599_v36 = vshrl.u32 %v1754_v5, %v1949_v24  ;;  %v400_v26 = vpop.f32.mrf.mxu1 }
  0xda   :  { %v491_v28 = vadd.s32 %v489_v59, %v487_v23  ;;  %v601_v39 = vshll.u32 %v1754_v5, %v592_v15  ;;  %v602_v40 = vshrl.u32 %v1755_v9, %v1949_v24  ;;  %v604_v41 = vshll.u32 %v1755_v9, %v592_v15 }
  0xdb   :  { %v514_v43 = vadd.s32 %v513_v32, %v503_v10  ;;  %v1967_v44 = vor.u32 %v596_v33, %v595_v31  ;;  %v1969_v45 = vor.u32 %v599_v36, %v598_v35  ;;  %v605_v46 = vshrl.u32 %v1756_v12, %v1949_v24 }
  0xdc   :  { %v492_v38 = vadd.s32 %v491_v28, %v481_v2  ;;  %v1975_v54 = vor.u32 %v602_v40, %v601_v39  ;;  %v607_v55 = vshll.u32 %v1756_v12, %v592_v15  ;;  %v608_v56 = vshrl.u32 %v1757_v16, %v1949_v24 }
  0xdd   :  { %v515_v58 = vadd.s32 %v514_v43, %v505_v20  ;;  %v606_v60 = vor.u32 %v605_v46, %v604_v41  ;;  %v350_v62 = vadd.f32 %v349_v42, %v285_v48  ;;  %vm610_vm12 = vcmp.lt.s32.totalorder %v1952_v27, 1 }
  0xde   :  { %v1973_v52 = vadd.s32 %v492_v38, %v483_v6  ;;  %v609_v0 = vor.u32 %v608_v56, %v607_v55  ;;  %v1983_v2 = vshll.u32 %v586_v47, 8  ;;  %v516_v3 = vmul.u32 %v1909_v50, %v1937_v49 }
  0xdf   :  { %v519_v61 = vadd.s32 1, %v515_v58  ;;  %vm613_vm13 = vcmp.lt.s32.totalorder %v1952_v27, 4  ;;  %v618_v4 = vsel %vm610_vm12, %v1967_v44, %v1969_v45  ;;  %vm612_vm14 = vcmp.lt.s32.totalorder %v1952_v27, 3 }
  0xe0   :  { %vm518_vm11 = vc.u32 %v1973_v52, %v1955_v30  ;;  %v619_v48 = vsel %vm613_vm13, %v606_v60, 920167782  ;;  %v622_v47 = vsel %vm610_vm12, %v1969_v45, %v1975_v54  ;;  %v623_v50 = vsel %vm613_vm13, %v609_v0, 1326507024 }
  0xe1   :  { %v520_v49 = vsel %vm518_vm11, %v519_v61, %v515_v58  ;;  %vm611_vm15 = vcmp.lt.s32.totalorder %v1952_v27, 2  ;;  %v620_v6 = vsel %vm612_vm14, %v1975_v54, %v619_v48  ;;  %v624_v7 = vsel %vm612_vm14, %v606_v60, %v623_v50 }
  0xe2   :  { %v521_v10 = vadd.s32 %v520_v49, %v516_v3  ;;  %v621_v11 = vsel %vm611_vm15, %v618_v4, %v620_v6  ;;  %v625_v14 = vsel %vm611_vm15, %v622_v47, %v624_v7  ;;  %v627_v15 = vand.u32 65535, %v1983_v2 }
  0xe3   :  { %v628_v18 = vshrl.u32 %v1983_v2, 16  ;;  %v629_v20 = vand.u32 65535, %v625_v14  ;;  %v630_v21 = vshrl.u32 %v625_v14, 16  ;;  %v652_v23 = vshrl.u32 %v621_v11, 16 }
  0xe4   :  { %v522_v57 = vadd.s32 536870912, %v521_v10  ;;  %v651_v59 = vand.u32 65535, %v621_v11  ;;  %v2015_v36 = vadd.f32 %v400_v26, %v350_v62  ;;  %v594_v14 = vshrl.u32 %v1752_v63, %v1949_v24 }
  0xe5   :  { %v632_v28 = vmul.u32 %v630_v21, %v627_v15  ;;  %v633_v29 = vmul.u32 %v629_v20, %v628_v18  ;;  %v654_v32 = vmul.u32 %v652_v23, %v627_v15  ;;  %v631_v33 = vmul.u32 %v629_v20, %v627_v15 }
  0xe6   :  { %v2013_v31 = vshrl.u32 %v522_v57, 30  ;;  %v634_v39 = vmul.u32 %v630_v21, %v628_v18  ;;  %v655_v40 = vmul.u32 %v651_v59, %v628_v18  ;;  %v653_v46 = vmul.u32 %v651_v59, %v627_v15 }
  0xe7   :  { %v635_v35 = vshll.u32 %v632_v28, 16  ;;  %v657_v41 = vshll.u32 %v654_v32, 16  ;;  %v637_v42 = vshll.u32 %v633_v29, 16  ;;  %v636_v56 = vshrl.u32 %v632_v28, 16 }
  0xe8   :  { %v524_v38 = vshll.u32 %v2013_v31, 30  ;;  %v656_v0 = vmul.u32 %v652_v23, %v628_v18  ;;  %v659_v61 = vshll.u32 %v655_v40, 16  ;;  %v736_v50 = vand.u32 2139095040, %v2015_v36 }
  0xe9   :  { %vm639_vm0 = vc.u32 %v631_v33, %v635_v35  ;;  %v641_v43 = vadd.s32 %v635_v35, %v631_v33  ;;  %vm661_vm2 = vc.u32 %v653_v46, %v657_v41  ;;  %v663_v47 = vadd.s32 %v657_v41, %v653_v46 }
  0xea   :  { %v525_v55 = vsub.s32 %v521_v10, %v524_v38  ;;  %v640_v58 = vsel %vm639_vm0, 1, %v1758_v17  ;;  %v662_v48 = vsel %vm661_vm2, 1, %v1758_v17  ;;  %v615_v10 = vsel %vm613_vm13, %v1975_v54, 2102212464 }
  0xeb   :  { %v642_v60 = vadd.s32 %v640_v58, %v634_v39  ;;  %vm643_vm1 = vc.u32 %v641_v43, %v637_v42  ;;  %v664_v6 = vadd.s32 %v662_v48, %v656_v0  ;;  %vm665_vm4 = vc.u32 %v663_v47, %v659_v61  ;;  %v227_v48 = vpop.f32.mrf.mxu2 }
  0xec   :  { %vm526_vm3 = vcmp.lt.s32.totalorder %v525_v55, 0  ;;  %v527_v62 = vsub.s32 0, %v525_v55  ;;  %v644_v3 = vsel %vm643_vm1, 1, %v1758_v17  ;;  %v638_v15 = vshrl.u32 %v633_v29, 16 }
  0xed   :  { %v646_v4 = vadd.s32 %v644_v3, %v642_v60  ;;  %v666_v18 = vsel %vm665_vm4, 1, %v1758_v17  ;;  %v658_v21 = vshrl.u32 %v654_v32, 16  ;;  %v737_v57 = vshrl.u32 %v736_v50, 23 }
  0xee   :  { %v528_v49 = vsel %vm526_vm3, %v527_v62, %v525_v55  ;;  %v668_v23 = vadd.s32 %v666_v18, %v664_v6  ;;  %v614_v59 = vsel %vm610_vm12, %v594_v14, %v1967_v44  ;;  %v616_v54 = vsel %vm612_vm14, %v1969_v45, %v615_v10 }
  0xef   :  { %v529_v7 = vclz %v528_v49  ;;  %v647_v11 = vadd.s32 %v646_v4, %v636_v56  ;;  %v660_v28 = vshrl.u32 %v655_v40, 16  ;;  %v517_v29 = vadd.s32 %v1955_v30, %v1973_v52 }
  0xf0   :  { %v669_v24 = vadd.s32 %v668_v23, %v658_v21  ;;  %v2038_v32 = vadd.s32 %v663_v47, %v659_v61  ;;  %v1698_v35 = vadd.s32 4294967169, %v737_v57  ;;  %v617_v44 = vsel %vm611_vm15, %v614_v59, %v616_v54  ;;  %v290_v57 = vpop.f32.mrf.mxu3 }
  0xf1   :  { %v1693_v20 = vadd.s32 4294967294, %v529_v7  ;;  %v2034_v26 = vadd.s32 %v647_v11, %v638_v15  ;;  %v547_v30 = vsub.s32 4, %v2013_v31  ;;  %v671_v52 = vmul.u32 %v1983_v2, %v617_v44 }
  0xf2   :  { %v670_v41 = vadd.s32 %v669_v24, %v660_v28  ;;  %v743_v45 = vadd.s32 1, %v1698_v35  ;;  %v733_v62 = vand.u32 2147483647, %v2015_v36  ;;  %vm425_vm8 = vcmp.lt.s32.totalorder %v1903_v34, 0 }
  0xf3   :  { %vm1694_vm5 = vcmp.lt.s32.totalorder %v1693_v20, 0  ;;  %vm673_vm6 = vc.u32 %v2034_v26, %v2038_v32  ;;  %vm2052_vm9 = vcmp.le.f32.partialorder %v423_v37, 0.7853982  ;;  %v548_v49 = vsel %vm425_vm8, %v547_v30, %v2013_v31  ;;  %v353_v30 = vpop.f32.mrf.mxu0 }
  0xf4   :  { %v532_v33 = vsel %vm1694_vm5, 0, %v1693_v20  ;;  %v674_v46 = vadd.s32 1, %v670_v41  ;;  %vm744_vm7 = vcmp.gt.s32.totalorder %v743_v45, 0  ;;  %v740_v7 = vand.u32 8388607, %v733_v62 }
  0xf5   :  { %v533_v38 = vsub.s32 32, %v532_v33  ;;  %v537_v39 = vsub.s32 4294967266, %v532_v33  ;;  %v534_v42 = vshll.u32 %v525_v55, %v532_v33  ;;  %v745_v0 = vsel %vm744_vm7, %v743_v45, 0 }
  0xf6   :  { %v675_v60 = vsel %vm673_vm6, %v674_v46, %v670_v41  ;;  %v747_v3 = vand.u32 31, %v745_v0  ;;  %v228_v18 = vadd.f32 %v227_v48, %v1899_v22  ;;  %v2076_v54 = vshrl.u32 %v745_v0, 5 }
  0xf7   :  { %v535_v40 = vshrl.u32 %v517_v29, %v533_v38  ;;  %v538_v43 = vadd.s32 127, %v537_v39  ;;  %v676_v27 = vadd.s32 %v675_v60, %v671_v52  ;;  %v741_v39 = vor.u32 8388608, %v740_v7 }
  0xf8   :  { %v2048_v4 = vsub.s32 32, %v747_v3  ;;  %v750_v14 = vshll.u32 %v1752_v63, %v747_v3  ;;  %v753_v20 = vshll.u32 %v1753_v1, %v747_v3  ;;  %v759_v23 = vshll.u32 %v1755_v9, %v747_v3 }
  0xf9   :  { %v536_v56 = vor.u32 %v535_v40, %v534_v42  ;;  %v539_v58 = vshll.u32 %v538_v43, 23  ;;  %v677_v55 = vadd.s32 536870912, %v676_v27  ;;  %v756_v28 = vshll.u32 %v1754_v5, %v747_v3 }
  0xfa   :  { %v751_v10 = vshrl.u32 %v1753_v1, %v2048_v4  ;;  %v754_v37 = vshrl.u32 %v1754_v5, %v2048_v4  ;;  %v760_v15 = vshrl.u32 %v1756_v12, %v2048_v4  ;;  %v757_v21 = vshrl.u32 %v1755_v9, %v2048_v4 }
  0xfb   :  { %v540_v61 = vor.u32 4788187, %v539_v58  ;;  %v543_v50 = vcvt.s32.f32 %v536_v56  ;;  %v2059_v6 = vshrl.u32 %v677_v55, 30  ;;  %v763_v24 = vshrl.u32 %v1757_v16, %v2048_v4 }
  0xfc   :  { %v2083_v22 = vor.u32 %v751_v10, %v750_v14  ;;  %v2085_v33 = vor.u32 %v754_v37, %v753_v20  ;;  %v761_v35 = vor.u32 %v760_v15, %v759_v23  ;;  %v762_v44 = vshll.u32 %v1756_v12, %v747_v3  ;;  %v404_v15 = vpop.f32.mrf.mxu1 }
  0xfd   :  { %v541_v47 = vand.u32 2147483647, %v540_v61  ;;  %v679_v31 = vshll.u32 %v2059_v6, 30  ;;  %v291_v41 = vadd.f32 %v290_v57, %v228_v18  ;;  %v2097_v40 = vor.u32 %v757_v21, %v756_v28 }
  0xfe   :  { %v550_v43 = vsel %vm2052_vm9, 0, %v548_v49  ;;  %vm765_vm11 = vcmp.lt.s32.totalorder %v2076_v54, 1  ;;  %vm768_vm12 = vcmp.lt.s32.totalorder %v2076_v54, 4  ;;  %vm580_vm13 = vcmp.lt.s32.totalorder %v1911_v51, 0 }
  0xff   :  { %v544_v11 = vmul.f32 %v543_v50, %v541_v47  ;;  %v2081_v29 = vsub.s32 %v676_v27, %v679_v31  ;;  %v764_v56 = vor.u32 %v763_v24, %v762_v44  ;;  %v773_v58 = vsel %vm765_vm11, %v2083_v22, %v2085_v33 }
 0x100   :  { %v774_v60 = vsel %vm768_vm12, %v761_v35, 920167782  ;;  %vm767_vm14 = vcmp.lt.s32.totalorder %v2076_v54, 3  ;;  %vm766_vm15 = vcmp.lt.s32.totalorder %v2076_v54, 2  ;;  %v2122_v55 = vshll.u32 %v741_v39, 8 }
 0x101   :  { %v545_v59 = vxor.u32 2147483648, %v544_v11  ;;  %vm681_vm10 = vcmp.lt.s32.totalorder %v2081_v29, 0  ;;  %v682_v42 = vsub.s32 0, %v2081_v29  ;;  %v775_v61 = vsel %vm767_vm14, %v2097_v40, %v774_v60 }
 0x102   :  { %v354_v48 = vadd.f32 %v353_v30, %v291_v41  ;;  %v776_v49 = vsel %vm766_vm15, %v773_v58, %v775_v61  ;;  %v567_v7 = vadd.s32 3, %v550_v43  ;;  %vm2128_vm0 = vcmp.le.f32.partialorder %v578_v53, 0.7853982 }
 0x103   :  { %v546_v38 = vsel %vm425_vm8, %v545_v59, %v544_v11  ;;  %v683_v52 = vsel %vm681_vm10, %v682_v42, %v2081_v29  ;;  %v702_v37 = vsub.s32 4, %v2059_v6  ;;  %v777_v11 = vsel %vm765_vm11, %v2085_v33, %v2097_v40 }
 0x104   :  { %v2093_v45 = vsel %vm2052_vm9, %v1903_v34, %v546_v38  ;;  %v684_v3 = vclz %v683_v52  ;;  %v778_v14 = vsel %vm768_vm12, %v764_v56, 1326507024  ;;  %v807_v31 = vshrl.u32 %v776_v49, 16 }
 0x105   :  { %v2103_v46 = vmul.f32 %v2093_v45, %v2093_v45  ;;  %v779_v53 = vsel %vm767_vm14, %v761_v35, %v778_v14  ;;  %v672_v20 = vadd.s32 %v2038_v32, %v2034_v26  ;;  %v782_v57 = vand.u32 65535, %v2122_v55 }
 0x106   :  { %v1696_v50 = vadd.s32 4294967294, %v684_v3  ;;  %v780_v23 = vsel %vm766_vm15, %v777_v11, %v779_v53  ;;  %v2148_v38 = vadd.f32 %v404_v15, %v354_v48  ;;  %v783_v44 = vshrl.u32 %v2122_v55, 16 }
 0x107   :  { %v552_v0 = vmul.f32 -0.001358992, %v2103_v46  ;;  %v559_v27 = vmul.f32 -0.00019511016, %v2103_v46  ;;  %v784_v35 = vand.u32 65535, %v780_v23  ;;  %v785_v41 = vshrl.u32 %v780_v23, 16 }
 0x108   :  { %vm1697_vm1 = vcmp.lt.s32.totalorder %v1696_v50, 0  ;;  %v703_v32 = vsel %vm580_vm13, %v702_v37, %v2059_v6  ;;  %v2155_v43 = vmul.u32 %v807_v31, %v782_v57  ;;  %v891_v3 = vand.u32 2139095040, %v2148_v38 }
 0x109   :  { %v553_v2 = vadd.f32 0.041655596, %v552_v0  ;;  %v560_v47 = vadd.f32 0.008332121, %v559_v27  ;;  %v687_v21 = vsel %vm1697_vm1, 0, %v1696_v50  ;;  %v787_v56 = vmul.u32 %v785_v41, %v782_v57 }
 0x10a   :  { %v688_v24 = vsub.s32 32, %v687_v21  ;;  %v692_v39 = vsub.s32 4294967266, %v687_v21  ;;  %v689_v30 = vshll.u32 %v2081_v29, %v687_v21  ;;  %v788_v58 = vmul.u32 %v784_v35, %v783_v44 }
 0x10b   :  { %v561_v18 = vmul.f32 %v560_v47, %v2103_v46  ;;  %v554_v59 = vmul.f32 %v553_v2, %v2103_v46  ;;  %v2158_v0 = vand.u32 3, %v567_v7  ;;  %v806_v27 = vand.u32 65535, %v776_v49 }
 0x10c   :  { %v690_v26 = vshrl.u32 %v672_v20, %v688_v24  ;;  %v693_v52 = vadd.s32 127, %v692_v39  ;;  %v786_v2 = vmul.u32 %v784_v35, %v782_v57  ;;  %v790_v47 = vshll.u32 %v787_v56, 16 }
 0x10d   :  { %v562_v28 = vadd.f32 -0.16666654, %v561_v18  ;;  %v555_v60 = vadd.f32 -0.4999988, %v554_v59  ;;  %v705_v6 = vsel %vm2128_vm0, 0, %v703_v32  ;;  %v789_v37 = vmul.u32 %v785_v41, %v783_v44 }
 0x10e   :  { %v691_v61 = vor.u32 %v690_v26, %v689_v30  ;;  %v694_v48 = vshll.u32 %v693_v52, 23  ;;  %v792_v11 = vshll.u32 %v788_v58, 16  ;;  %vm794_vm2 = vc.u32 %v786_v2, %v790_v47 }
 0x10f   :  { %v563_v42 = vmul.f32 %v562_v28, %v2103_v46  ;;  %v796_v14 = vadd.s32 %v790_v47, %v786_v2  ;;  %v812_v15 = vshll.u32 %v2155_v43, 16  ;;  %v556_v7 = vmul.f32 %v555_v60, %v2103_v46 }
 0x110   :  { %v695_v29 = vor.u32 4788187, %v694_v48  ;;  %v795_v49 = vsel %vm794_vm2, 1, %v1758_v17  ;;  %v808_v18 = vmul.u32 %v806_v27, %v782_v57  ;;  %v810_v53 = vmul.u32 %v806_v27, %v783_v44 }
 0x111   :  { %v564_v50 = vadd.f32 1.0, %v563_v42  ;;  %v698_v21 = vcvt.s32.f32 %v691_v61  ;;  %v797_v23 = vadd.s32 %v795_v49, %v789_v37  ;;  %vm798_vm3 = vc.u32 %v796_v14, %v792_v11 }
 0x112   :  { %v696_v20 = vand.u32 2147483647, %v695_v29  ;;  %v791_v59 = vshrl.u32 %v787_v56, 16  ;;  %v799_v28 = vsel %vm798_vm3, 1, %v1758_v17  ;;  %v811_v24 = vmul.u32 %v807_v31, %v783_v44 }
 0x113   :  { %vm816_vm4 = vc.u32 %v808_v18, %v812_v15  ;;  %v565_v39 = vmul.f32 %v564_v50, %v2093_v45  ;;  %vm570_vm5 = vcmp.eq.s32.totalorder %v2158_v0, 0  ;;  %v801_v41 = vadd.s32 %v799_v28, %v797_v23 }
 0x114   :  { %v699_v35 = vmul.f32 %v698_v21, %v696_v20  ;;  %v817_v46 = vsel %vm816_vm4, 1, %v1758_v17  ;;  %v814_v42 = vshll.u32 %v810_v53, 16  ;;  %v818_v57 = vadd.s32 %v812_v15, %v808_v18 }
 0x115   :  { %v819_v26 = vadd.s32 %v817_v46, %v811_v24  ;;  %v888_v32 = vand.u32 2147483647, %v2148_v38  ;;  %vm573_vm6 = vcmp.eq.s32.totalorder %v2158_v0, 2  ;;  %v722_v52 = vadd.s32 3, %v705_v6 }
 0x116   :  { %v700_v30 = vxor.u32 2147483648, %v699_v35  ;;  %v749_v31 = vshrl.u32 %v1752_v63, %v2048_v4  ;;  %v802_v44 = vadd.s32 %v801_v41, %v791_v59  ;;  %v557_v45 = vadd.f32 1.0, %v556_v7 }
 0x117   :  { %vm569_vm7 = vcmp.lt.s32.totalorder %v2158_v0, 2  ;;  %v770_v56 = vsel %vm768_vm12, %v2097_v40, 2102212464  ;;  %vm820_vm8 = vc.u32 %v818_v57, %v814_v42  ;;  %v892_v60 = vshrl.u32 %v891_v3, 23 }
 0x118   :  { %v571_v27 = vxor.u32 2147483648, %v565_v39  ;;  %v701_v61 = vsel %vm580_vm13, %v700_v30, %v699_v35  ;;  %v793_v48 = vshrl.u32 %v788_v58, 16  ;;  %v821_v2 = vsel %vm820_vm8, 1, %v1758_v17 }
 0x119   :  { %v2184_v4 = vsel %vm2128_vm0, %v1911_v51, %v701_v61  ;;  %v813_v47 = vshrl.u32 %v2155_v43, 16  ;;  %v823_v50 = vadd.s32 %v821_v2, %v819_v26  ;;  %v1701_v6 = vadd.s32 4294967169, %v892_v60 }
 0x11a   :  { %v706_v40 = vmul.f32 %v2184_v4, %v2184_v4  ;;  %v769_v3 = vsel %vm765_vm11, %v749_v31, %v2083_v22  ;;  %v771_v58 = vsel %vm767_vm14, %v2085_v33, %v770_v56  ;;  %v2195_v37 = vadd.s32 %v802_v44, %v793_v48 }
 0x11b   :  { %v574_v10 = vxor.u32 2147483648, %v557_v45  ;;  %v815_v11 = vshrl.u32 %v810_v53, 16  ;;  %v824_v29 = vadd.s32 %v823_v50, %v813_v47  ;;  %v898_v14 = vadd.s32 1, %v1701_v6 }
 0x11c   :  { %v707_v43 = vmul.f32 -0.001358992, %v706_v40  ;;  %v714_v15 = vmul.f32 -0.00019511016, %v706_v40  ;;  %v2197_v7 = vand.u32 3, %v722_v52  ;;  %v2199_v49 = vadd.s32 %v818_v57, %v814_v42 }
 0x11d   :  { %v572_v18 = vsel %vm570_vm5, %v557_v45, %v571_v27  ;;  %v772_v22 = vsel %vm766_vm15, %v769_v3, %v771_v58  ;;  %v825_v20 = vadd.s32 %v824_v29, %v815_v11  ;;  %vm899_vm9 = vcmp.gt.s32.totalorder %v898_v14, 0 }
 0x11e   :  { %v708_v33 = vadd.f32 0.041655596, %v707_v43  ;;  %v715_v21 = vadd.f32 0.008332121, %v714_v15  ;;  %vm828_vm10 = vc.u32 %v2195_v37, %v2199_v49  ;;  %v900_v53 = vsel %vm899_vm9, %v898_v14, 0 }
 0x11f   :  { %v575_v23 = vsel %vm573_vm6, %v574_v10, %v565_v39  ;;  %v829_v59 = vadd.s32 1, %v825_v20  ;;  %v895_v28 = vand.u32 8388607, %v888_v32  ;;  %v902_v24 = vand.u32 31, %v900_v53 }
 0x120   :  { %v576_v54 = vsel %vm569_vm7, %v572_v18, %v575_v23  ;;  %v709_v35 = vmul.f32 %v708_v33, %v706_v40  ;;  %v716_v41 = vmul.f32 %v715_v21, %v706_v40  ;;  %v826_v46 = vmul.u32 %v2122_v55, %v772_v22  ;;  %v2248_v18 = vld [vmem:[%s2848_s1 + $0x10] ss:$0 sm:$0xff]  ;;  %v296_v23 = vpop.f32.mrf.mxu3 }
 0x121   :  { %vm566_vm11 = vweird.f32 %v1903_v34  ;;  %v830_v42 = vsel %vm828_vm10, %v829_v59, %v825_v20  ;;  %v2215_v57 = vsub.s32 32, %v902_v24  ;;  %vm728_vm12 = vcmp.eq.s32.totalorder %v2197_v7, 2 }
 0x122   :  { %v710_v26 = vadd.f32 -0.4999988, %v709_v35  ;;  %v717_v30 = vadd.f32 -0.16666654, %v716_v41  ;;  %v831_v39 = vadd.s32 %v830_v42, %v826_v46  ;;  %v577_v52 = vsel %vm566_vm11, nan, %v576_v54 }
 0x123   :  { %vm725_vm13 = vcmp.eq.s32.totalorder %v2197_v7, 0  ;;  %v896_v31 = vor.u32 8388608, %v895_v28  ;;  %v2219_v0 = vshrl.u32 %v900_v53, 5  ;;  %v906_v44 = vshrl.u32 %v1753_v1, %v2215_v57 }
 0x124   :  { %v711_v55 = vmul.f32 %v710_v26, %v706_v40  ;;  %v718_v45 = vmul.f32 %v717_v30, %v706_v40  ;;  %vm724_vm14 = vcmp.lt.s32.totalorder %v2197_v7, 2  ;;  %v832_v34 = vadd.s32 536870912, %v831_v39  ;;  %v232_v40 = vpop.f32.mrf.mxu2 }
 0x125   :  { %v909_v56 = vshrl.u32 %v1754_v5, %v2215_v57  ;;  %vm721_vm15 = vweird.f32 %v1911_v51  ;;  %v905_v60 = vshll.u32 %v1752_v63, %v902_v24  ;;  %v912_v27 = vshrl.u32 %v1755_v9, %v2215_v57 }
 0x126   :  { %v914_v61 = vshll.u32 %v1755_v9, %v902_v24  ;;  %v915_v48 = vshrl.u32 %v1756_v12, %v2215_v57  ;;  %v712_v2 = vadd.f32 1.0, %v711_v55  ;;  %v719_v47 = vadd.f32 1.0, %v718_v45 }
 0x127   :  { %v2233_v50 = vshrl.u32 %v832_v34, 30  ;;  %v908_v6 = vshll.u32 %v1753_v1, %v902_v24  ;;  %v2236_v3 = vor.u32 %v906_v44, %v905_v60  ;;  %v911_v58 = vshll.u32 %v1754_v5, %v902_v24 }
 0x128   :  { %v916_v10 = vor.u32 %v915_v48, %v914_v61  ;;  %v918_v11 = vshrl.u32 %v1757_v16, %v2215_v57  ;;  %v720_v29 = vmul.f32 %v719_v47, %v2184_v4  ;;  %v729_v14 = vxor.u32 2147483648, %v712_v2 }
 0x129   :  { %v834_v43 = vshll.u32 %v2233_v50, 30  ;;  %v2243_v15 = vor.u32 %v909_v56, %v908_v6  ;;  %v2250_v22 = vor.u32 %v912_v27, %v911_v58  ;;  %v917_v20 = vshll.u32 %v1756_v12, %v902_v24 }
 0x12a   :  { %v2253_v33 = vshll.u32 %v896_v31, 8  ;;  %v233_v21 = vadd.f32 %v232_v40, %v1893_v8  ;;  %v726_v53 = vxor.u32 2147483648, %v720_v29  ;;  %vm920_vm0 = vcmp.lt.s32.totalorder %v2219_v0, 1  ;;  %v408_v40 = vpop.f32.mrf.mxu1 }
 0x12b   :  { %v835_v4 = vsub.s32 %v831_v39, %v834_v43  ;;  %vm923_vm1 = vcmp.lt.s32.totalorder %v2219_v0, 4  ;;  %v730_v59 = vsel %vm728_vm12, %v729_v14, %v720_v29  ;;  %v919_v28 = vor.u32 %v918_v11, %v917_v20 }
 0x12c   :  { %vm922_vm2 = vcmp.lt.s32.totalorder %v2219_v0, 3  ;;  %v929_v24 = vsel %vm923_vm1, %v916_v10, 920167782  ;;  %v727_v54 = vsel %vm725_vm13, %v712_v2, %v726_v53  ;;  %v928_v35 = vsel %vm920_vm0, %v2236_v3, %v2243_v15 }
 0x12d   :  { %vm836_vm3 = vcmp.lt.s32.totalorder %v835_v4, 0  ;;  %v837_v8 = vsub.s32 0, %v835_v4  ;;  %v1664_v41 = vmul.f32 %v2248_v18, %v577_v52  ;;  %v731_v46 = vsel %vm724_vm14, %v727_v54, %v730_v59  ;;  %v357_v52 = vpop.f32.mrf.mxu0 }
 0x12e   :  { %v930_v42 = vsel %vm922_vm2, %v2250_v22, %v929_v24  ;;  %v297_v26 = vadd.f32 %v296_v23, %v233_v21  ;;  %v732_v30 = vsel %vm721_vm15, nan, %v731_v46  ;;  %vm921_vm4 = vcmp.lt.s32.totalorder %v2219_v0, 2 }
 0x12f   :  { %v838_v39 = vsel %vm836_vm3, %v837_v8, %v835_v4  ;;  %v932_v31 = vsel %vm920_vm0, %v2243_v15, %v2250_v22  ;;  %v1665_v7 = vmul.f32 %v2248_v18, %v732_v30  ;;  %v931_v55 = vsel %vm921_vm4, %v928_v35, %v930_v42 }
 0x130   :  { %v839_v44 = vclz %v838_v39  ;;  %v933_v45 = vsel %vm923_vm1, %v919_v28, 1326507024  ;;  %v937_v34 = vand.u32 65535, %v2253_v33  ;;  %v358_v61 = vadd.f32 %v357_v52, %v297_v26 }
 0x131   :  { %v934_v51 = vsel %vm922_vm2, %v916_v10, %v933_v45  ;;  %v1719_v56 = vpack.c.bf16 %v1665_v7, %v1664_v41  ;;  %v938_v48 = vshrl.u32 %v2253_v33, 16  ;;  %v961_v6 = vand.u32 65535, %v931_v55 }
 0x132   :  { %v1699_v60 = vadd.s32 4294967294, %v839_v44  ;;  %v935_v27 = vsel %vm921_vm4, %v932_v31, %v934_v51  ;;  %v962_v58 = vshrl.u32 %v931_v55, 16  ;;  %v827_v14 = vadd.s32 %v2199_v49, %v2195_v37 }
 0x133   :  { %v939_v2 = vand.u32 65535, %v935_v27  ;;  %v940_v47 = vshrl.u32 %v935_v27, 16  ;;  %1720 = vst [vmem:[%s2850_s2] sm:$0xff] %v1719_v56   ;;  %v2298_v21 = vadd.f32 %v408_v40, %v358_v61  ;;  %v963_v59 = vmul.u32 %v961_v6, %v937_v34 }
 0x134   :  { %vm1700_vm5 = vcmp.lt.s32.totalorder %v1699_v60, 0  ;;  %v965_v28 = vmul.u32 %v961_v6, %v938_v48  ;;  %v964_v35 = vmul.u32 %v962_v58, %v937_v34  ;;  %v966_v44 = vmul.u32 %v962_v58, %v938_v48 }
 0x135   :  { %v842_v10 = vsel %vm1700_vm5, 0, %v1699_v60  ;;  %v942_v11 = vmul.u32 %v940_v47, %v937_v34  ;;  %v943_v29 = vmul.u32 %v939_v2, %v938_v48  ;;  %v941_v53 = vmul.u32 %v939_v2, %v937_v34 }
 0x136   :  { %v843_v43 = vsub.s32 32, %v842_v10  ;;  %v847_v20 = vsub.s32 4294967266, %v842_v10  ;;  %v844_v24 = vshll.u32 %v835_v4, %v842_v10  ;;  %v944_v41 = vmul.u32 %v940_v47, %v938_v48 }
 0x137   :  { %v945_v23 = vshll.u32 %v942_v11, 16  ;;  %v947_v46 = vshll.u32 %v943_v29, 16  ;;  %v967_v49 = vshll.u32 %v964_v35, 16  ;;  %v946_v39 = vshrl.u32 %v942_v11, 16 }
 0x138   :  { %v845_v54 = vshrl.u32 %v827_v14, %v843_v43  ;;  %v848_v8 = vadd.s32 127, %v847_v20  ;;  %v969_v55 = vshll.u32 %v965_v28, 16  ;;  %v1046_v27 = vand.u32 2139095040, %v2298_v21 }
 0x139   :  { %vm949_vm6 = vc.u32 %v941_v53, %v945_v23  ;;  %v951_v42 = vadd.s32 %v945_v23, %v941_v53  ;;  %vm971_vm8 = vc.u32 %v963_v59, %v967_v49  ;;  %v973_v51 = vadd.s32 %v967_v49, %v963_v59 }
 0x13a   :  { %v846_v26 = vor.u32 %v845_v54, %v844_v24  ;;  %v849_v30 = vshll.u32 %v848_v8, 23  ;;  %v950_v37 = vsel %vm949_vm6, 1, %v1758_v17  ;;  %v972_v45 = vsel %vm971_vm8, 1, %v1758_v17 }
 0x13b   :  { %v952_v31 = vadd.s32 %v950_v37, %v944_v41  ;;  %vm953_vm7 = vc.u32 %v951_v42, %v947_v46  ;;  %v974_v60 = vadd.s32 %v972_v45, %v966_v44  ;;  %v904_v61 = vshrl.u32 %v1752_v63, %v2215_v57 }
 0x13c   :  { %v850_v52 = vor.u32 4788187, %v849_v30  ;;  %v954_v7 = vsel %vm953_vm7, 1, %v1758_v17  ;;  %v853_v56 = vcvt.s32.f32 %v846_v26  ;;  %v925_v2 = vsel %vm923_vm1, %v2250_v22, 2102212464  ;;  %v237_v26 = vpop.f32.mrf.mxu2 }
 0x13d   :  { %v956_v4 = vadd.s32 %v954_v7, %v952_v31  ;;  %vm975_vm9 = vc.u32 %v973_v51, %v969_v55  ;;  %v948_v6 = vshrl.u32 %v943_v29, 16  ;;  %v1047_v58 = vshrl.u32 %v1046_v27, 23 }
 0x13e   :  { %v851_v34 = vand.u32 2147483647, %v850_v52  ;;  %v976_v40 = vsel %vm975_vm9, 1, %v1758_v17  ;;  %v924_v10 = vsel %vm920_vm0, %v904_v61, %v2236_v3  ;;  %v968_v11 = vshrl.u32 %v964_v35, 16 }
 0x13f   :  { %v957_v47 = vadd.s32 %v956_v4, %v946_v39  ;;  %v978_v14 = vadd.s32 %v976_v40, %v974_v60  ;;  %v926_v57 = vsel %vm922_vm2, %v2243_v15, %v925_v2  ;;  %v1704_v22 = vadd.s32 4294967169, %v1047_v58  ;;  %v302_v4 = vpop.f32.mrf.mxu3  ;;  %v361_v58 = vpop.f32.mrf.mxu0 }
 0x140   :  { %v854_v48 = vmul.f32 %v853_v56, %v851_v34  ;;  %vm735_vm10 = vcmp.lt.s32.totalorder %v2015_v36, 0  ;;  %v857_v29 = vsub.s32 4, %v2233_v50  ;;  %v970_v53 = vshrl.u32 %v965_v28, 16 }
 0x141   :  { %v2316_v20 = vadd.s32 %v957_v47, %v948_v6  ;;  %v979_v23 = vadd.s32 %v978_v14, %v968_v11  ;;  %vm2322_vm11 = vcmp.le.f32.partialorder %v733_v62, 0.7853982  ;;  %v2326_v24 = vadd.s32 %v973_v51, %v969_v55 }
 0x142   :  { %v855_v43 = vxor.u32 2147483648, %v854_v48  ;;  %v1053_v54 = vadd.s32 1, %v1704_v22  ;;  %v927_v8 = vsel %vm921_vm4, %v924_v10, %v926_v57  ;;  %v858_v62 = vsel %vm735_vm10, %v857_v29, %v2233_v50 }
 0x143   :  { %v980_v28 = vadd.s32 %v979_v23, %v970_v53  ;;  %vm983_vm12 = vc.u32 %v2316_v20, %v2326_v24  ;;  %v1043_v46 = vand.u32 2147483647, %v2298_v21  ;;  %v981_v37 = vmul.u32 %v2253_v33, %v927_v8 }
 0x144   :  { %v856_v59 = vsel %vm735_vm10, %v855_v43, %v854_v48  ;;  %vm1054_vm13 = vcmp.gt.s32.totalorder %v1053_v54, 0  ;;  %v860_v31 = vsel %vm2322_vm11, 0, %v858_v62  ;;  %v238_v50 = vadd.f32 %v237_v26, %v1895_v13  ;;  %v412_v62 = vpop.f32.mrf.mxu1 }
 0x145   :  { %v2331_v15 = vsel %vm2322_vm11, %v2015_v36, %v856_v59  ;;  %v984_v41 = vadd.s32 1, %v980_v28  ;;  %v1055_v42 = vsel %vm1054_vm13, %v1053_v54, 0  ;;  %v1050_v51 = vand.u32 8388607, %v1043_v46 }
 0x146   :  { %v2337_v35 = vmul.f32 %v2331_v15, %v2331_v15  ;;  %v1057_v49 = vand.u32 31, %v1055_v42  ;;  %v877_v34 = vadd.s32 3, %v860_v31  ;;  %v2359_v61 = vshrl.u32 %v1055_v42, 5 }
 0x147   :  { %v985_v39 = vsel %vm983_vm12, %v984_v41, %v980_v28  ;;  %v303_v2 = vadd.f32 %v302_v4, %v238_v50  ;;  %v1051_v14 = vor.u32 8388608, %v1050_v51  ;;  %vm890_vm14 = vcmp.lt.s32.totalorder %v2148_v38, 0 }
 0x148   :  { %v862_v30 = vmul.f32 -0.001358992, %v2337_v35  ;;  %v869_v0 = vmul.f32 -0.00019511016, %v2337_v35  ;;  %v986_v52 = vadd.s32 %v985_v39, %v981_v37  ;;  %v2348_v7 = vsub.s32 32, %v1057_v49 }
 0x149   :  { %v1060_v13 = vshll.u32 %v1752_v63, %v1057_v49  ;;  %v1063_v48 = vshll.u32 %v1753_v1, %v1057_v49  ;;  %v1069_v40 = vshll.u32 %v1755_v9, %v1057_v49  ;;  %v1066_v43 = vshll.u32 %v1754_v5, %v1057_v49 }
 0x14a   :  { %v870_v44 = vadd.f32 0.008332121, %v869_v0  ;;  %v863_v55 = vadd.f32 0.041655596, %v862_v30  ;;  %v987_v45 = vadd.s32 536870912, %v986_v52  ;;  %v1061_v33 = vshrl.u32 %v1753_v1, %v2348_v7 }
 0x14b   :  { %v1064_v56 = vshrl.u32 %v1754_v5, %v2348_v7  ;;  %v1070_v60 = vshrl.u32 %v1756_v12, %v2348_v7  ;;  %v1067_v6 = vshrl.u32 %v1755_v9, %v2348_v7  ;;  %v1073_v53 = vshrl.u32 %v1757_v16, %v2348_v7 }
 0x14c   :  { %v988_v27 = vshrl.u32 %v987_v45, 30  ;;  %v871_v47 = vmul.f32 %v870_v44, %v2337_v35  ;;  %v864_v10 = vmul.f32 %v863_v55, %v2337_v35  ;;  %v1062_v57 = vor.u32 %v1061_v33, %v1060_v13 }
 0x14d   :  { %v2369_v22 = vor.u32 %v1064_v56, %v1063_v48  ;;  %v1071_v29 = vor.u32 %v1070_v60, %v1069_v40  ;;  %v1072_v3 = vshll.u32 %v1756_v12, %v1057_v49  ;;  %v362_v59 = vadd.f32 %v361_v58, %v303_v2 }
 0x14e   :  { %v989_v11 = vshll.u32 %v988_v27, 30  ;;  %v872_v54 = vadd.f32 -0.16666654, %v871_v47  ;;  %v2375_v8 = vand.u32 3, %v877_v34  ;;  %v2377_v28 = vor.u32 %v1067_v6, %v1066_v43 }
 0x14f   :  { %vm1075_vm15 = vcmp.lt.s32.totalorder %v2359_v61, 1  ;;  %v1074_v42 = vor.u32 %v1073_v53, %v1072_v3  ;;  %vm1078_vm1 = vcmp.lt.s32.totalorder %v2359_v61, 4  ;;  %v865_v26 = vadd.f32 -0.4999988, %v864_v10 }
 0x150   :  { %v990_v23 = vsub.s32 %v986_v52, %v989_v11  ;;  %vm2383_vm2 = vcmp.le.f32.partialorder %v888_v32, 0.7853982  ;;  %v1083_v0 = vsel %vm1075_vm15, %v1062_v57, %v2369_v22  ;;  %v1084_v37 = vsel %vm1078_vm1, %v1071_v29, 920167782 }
 0x151   :  { %v2392_v49 = vshll.u32 %v1051_v14, 8  ;;  %v1012_v31 = vsub.s32 4, %v988_v27  ;;  %vm1077_vm3 = vcmp.lt.s32.totalorder %v2359_v61, 3  ;;  %v2395_v52 = vadd.f32 %v412_v62, %v362_v59 }
 0x152   :  { %vm991_vm0 = vcmp.lt.s32.totalorder %v990_v23, 0  ;;  %v992_v41 = vsub.s32 0, %v990_v23  ;;  %v982_v32 = vadd.s32 %v2326_v24, %v2316_v20  ;;  %vm1076_vm4 = vcmp.lt.s32.totalorder %v2359_v61, 2 }
 0x153   :  { %v1085_v44 = vsel %vm1077_vm3, %v2377_v28, %v1084_v37  ;;  %v873_v4 = vmul.f32 %v872_v54, %v2337_v35  ;;  %v1087_v45 = vsel %vm1075_vm15, %v2369_v22, %v2377_v28  ;;  %v1088_v20 = vsel %vm1078_vm1, %v1074_v42, 1326507024 }
 0x154   :  { %v993_v39 = vsel %vm991_vm0, %v992_v41, %v990_v23  ;;  %v1086_v55 = vsel %vm1076_vm4, %v1083_v0, %v1085_v44  ;;  %v866_v24 = vmul.f32 %v865_v26, %v2337_v35  ;;  %v1092_v34 = vand.u32 65535, %v2392_v49 }
 0x155   :  { %v994_v50 = vclz %v993_v39  ;;  %v1093_v33 = vshrl.u32 %v2392_v49, 16  ;;  %v2417_v56 = vsel %vm890_vm14, %v1012_v31, %v988_v27  ;;  %v1059_v60 = vshrl.u32 %v1752_v63, %v2348_v7 }
 0x156   :  { %v1089_v13 = vsel %vm1077_vm3, %v1071_v29, %v1088_v20  ;;  %v1201_v2 = vand.u32 2139095040, %v2395_v52  ;;  %v1116_v47 = vand.u32 65535, %v1086_v55  ;;  %v1117_v48 = vshrl.u32 %v1086_v55, 16 }
 0x157   :  { %v1702_v51 = vadd.s32 4294967294, %v994_v50  ;;  %v1090_v35 = vsel %vm1076_vm4, %v1087_v45, %v1089_v13  ;;  %v874_v6 = vadd.f32 1.0, %v873_v4  ;;  %v2426_v27 = vadd.f32 1.0, %v866_v24 }
 0x158   :  { %v1094_v58 = vand.u32 65535, %v1090_v35  ;;  %v1095_v10 = vshrl.u32 %v1090_v35, 16  ;;  %v1119_v7 = vmul.u32 %v1117_v48, %v1092_v34  ;;  %v1015_v43 = vsel %vm2383_vm2, 0, %v2417_v56 }
 0x159   :  { %vm1703_vm5 = vcmp.lt.s32.totalorder %v1702_v51, 0  ;;  %v1079_v29 = vsel %vm1075_vm15, %v1059_v60, %v1062_v57  ;;  %v1120_v41 = vmul.u32 %v1116_v47, %v1093_v33  ;;  %v875_v42 = vmul.f32 %v874_v6, %v2331_v15 }
 0x15a   :  { %v997_v40 = vsel %vm1703_vm5, 0, %v1702_v51  ;;  %v1097_v53 = vmul.u32 %v1095_v10, %v1092_v34  ;;  %v1098_v3 = vmul.u32 %v1094_v58, %v1093_v33  ;;  %v1096_v26 = vmul.u32 %v1094_v58, %v1092_v34 }
 0x15b   :  { %v998_v11 = vsub.s32 32, %v997_v40  ;;  %v1002_v14 = vsub.s32 4294967266, %v997_v40  ;;  %v999_v59 = vshll.u32 %v990_v23, %v997_v40  ;;  %v1118_v37 = vmul.u32 %v1116_v47, %v1092_v34 }
 0x15c   :  { %v1100_v0 = vshll.u32 %v1097_v53, 16  ;;  %v1099_v50 = vmul.u32 %v1095_v10, %v1093_v33  ;;  %v1122_v44 = vshll.u32 %v1119_v7, 16  ;;  %vm880_vm6 = vcmp.eq.s32.totalorder %v2375_v8, 0 }
 0x15d   :  { %v1000_v54 = vshrl.u32 %v982_v32, %v998_v11  ;;  %v1003_v62 = vadd.s32 127, %v1002_v14  ;;  %v1102_v4 = vshll.u32 %v1098_v3, 16  ;;  %v1121_v55 = vmul.u32 %v1117_v48, %v1093_v33 }
 0x15e   :  { %vm1104_vm7 = vc.u32 %v1096_v26, %v1100_v0  ;;  %v1106_v57 = vadd.s32 %v1100_v0, %v1096_v26  ;;  %v1124_v32 = vshll.u32 %v1120_v41, 16  ;;  %vm1126_vm8 = vc.u32 %v1118_v37, %v1122_v44 }
 0x15f   :  { %v1001_v39 = vor.u32 %v1000_v54, %v999_v59  ;;  %v1004_v31 = vshll.u32 %v1003_v62, 23  ;;  %v1105_v23 = vsel %vm1104_vm7, 1, %v1758_v17  ;;  %vm883_vm9 = vcmp.eq.s32.totalorder %v2375_v8, 2 }
 0x160   :  { %v1107_v15 = vadd.s32 %v1105_v23, %v1099_v50  ;;  %vm1108_vm10 = vc.u32 %v1106_v57, %v1102_v4  ;;  %v1127_v20 = vsel %vm1126_vm8, 1, %v1758_v17  ;;  %v1128_v24 = vadd.s32 %v1122_v44, %v1118_v37 }
 0x161   :  { %v1005_v45 = vor.u32 4788187, %v1004_v31  ;;  %vm879_vm11 = vcmp.lt.s32.totalorder %v2375_v8, 2  ;;  %v1008_v34 = vcvt.s32.f32 %v1001_v39  ;;  %v1109_v56 = vsel %vm1108_vm10, 1, %v1758_v17 }
 0x162   :  { %v1129_v60 = vadd.s32 %v1127_v20, %v1121_v55  ;;  %v1080_v33 = vsel %vm1078_vm1, %v2377_v28, 2102212464  ;;  %v1101_v13 = vshrl.u32 %v1097_v53, 16  ;;  %v1111_v35 = vadd.s32 %v1109_v56, %v1107_v15 }
 0x163   :  { %v1006_v51 = vand.u32 2147483647, %v1005_v45  ;;  %vm1130_vm12 = vc.u32 %v1128_v24, %v1124_v32  ;;  %v881_v47 = vxor.u32 2147483648, %v875_v42  ;;  %v1202_v40 = vshrl.u32 %v1201_v2, 23  ;;  %v242_v45 = vpop.f32.mrf.mxu2 }
 0x164   :  { %v1131_v6 = vsel %vm1130_vm12, 1, %v1758_v17  ;;  %v1103_v58 = vshrl.u32 %v1098_v3, 16  ;;  %v1112_v10 = vadd.s32 %v1111_v35, %v1101_v13  ;;  %v1123_v11 = vshrl.u32 %v1119_v7, 16 }
 0x165   :  { %v1009_v48 = vmul.f32 %v1008_v34, %v1006_v51  ;;  %v1133_v14 = vadd.s32 %v1131_v6, %v1129_v60  ;;  %v884_v59 = vxor.u32 2147483648, %v2426_v27  ;;  %v1081_v62 = vsel %vm1077_vm3, %v2369_v22, %v1080_v33 }
 0x166   :  { %v1707_v28 = vadd.s32 4294967169, %v1202_v40  ;;  %v2448_v53 = vadd.s32 %v1112_v10, %v1103_v58  ;;  %v1125_v26 = vshrl.u32 %v1120_v41, 16  ;;  %v1198_v37 = vand.u32 2147483647, %v2395_v52 }
 0x167   :  { %v1010_v54 = vxor.u32 2147483648, %v1009_v48  ;;  %v1134_v0 = vadd.s32 %v1133_v14, %v1123_v11  ;;  %v882_v2 = vsel %vm880_vm6, %v2426_v27, %v881_v47  ;;  %v2456_v3 = vadd.s32 %v1128_v24, %v1124_v32 }
 0x168   :  { %v1208_v39 = vadd.s32 1, %v1707_v28  ;;  %v1032_v31 = vadd.s32 3, %v1015_v43  ;;  %v1082_v41 = vsel %vm1076_vm4, %v1079_v29, %v1081_v62  ;;  %v885_v44 = vsel %vm883_vm9, %v884_v59, %v875_v42  ;;  %v308_v59 = vpop.f32.mrf.mxu3 }
 0x169   :  { %v1011_v7 = vsel %vm890_vm14, %v1010_v54, %v1009_v48  ;;  %v1135_v50 = vadd.s32 %v1134_v0, %v1125_v26  ;;  %vm1138_vm13 = vc.u32 %v2448_v53, %v2456_v3  ;;  %v886_v30 = vsel %vm879_vm11, %v882_v2, %v885_v44 }
 0x16a   :  { %v2461_v22 = vsel %vm2383_vm2, %v2148_v38, %v1011_v7  ;;  %vm1209_vm14 = vcmp.gt.s32.totalorder %v1208_v39, 0  ;;  %v1205_v43 = vand.u32 8388607, %v1198_v37  ;;  %v1136_v55 = vmul.u32 %v2392_v49, %v1082_v41 }
 0x16b   :  { %v1016_v27 = vmul.f32 %v2461_v22, %v2461_v22  ;;  %v1139_v4 = vadd.s32 1, %v1135_v50  ;;  %v1210_v61 = vsel %vm1209_vm14, %v1208_v39, 0  ;;  %vm876_vm15 = vweird.f32 %v2015_v36 }
 0x16c   :  { %v1212_v42 = vand.u32 31, %v1210_v61  ;;  %v2477_v23 = vand.u32 3, %v1032_v31  ;;  %v887_v51 = vsel %vm876_vm15, nan, %v886_v30  ;;  %v243_v34 = vadd.f32 %v242_v45, %v1897_v19 }
 0x16d   :  { %v1017_v29 = vmul.f32 -0.001358992, %v1016_v27  ;;  %v1024_v57 = vmul.f32 -0.00019511016, %v1016_v27  ;;  %v1140_v32 = vsel %vm1138_vm13, %v1139_v4, %v1135_v50  ;;  %v1206_v13 = vor.u32 8388608, %v1205_v43  ;;  %v365_v4 = vpop.f32.mrf.mxu0 }
 0x16e   :  { %v1141_v8 = vadd.s32 %v1140_v32, %v1136_v55  ;;  %v2479_v24 = vsub.s32 32, %v1212_v42  ;;  %v2482_v49 = vshrl.u32 %v1210_v61, 5  ;;  %vm1038_vm0 = vcmp.eq.s32.totalorder %v2477_v23, 2 }
 0x16f   :  { %v1018_v15 = vadd.f32 0.041655596, %v1017_v29  ;;  %v1025_v20 = vadd.f32 0.008332121, %v1024_v57  ;;  %v1215_v40 = vshll.u32 %v1752_v63, %v1212_v42  ;;  %vm1035_vm1 = vcmp.eq.s32.totalorder %v2477_v23, 0 }
 0x170   :  { %v1142_v33 = vadd.s32 536870912, %v1141_v8  ;;  %v1216_v36 = vshrl.u32 %v1753_v1, %v2479_v24  ;;  %v1219_v35 = vshrl.u32 %v1754_v5, %v2479_v24  ;;  %v1225_v47 = vshrl.u32 %v1756_v12, %v2479_v24 }
 0x171   :  { %v1019_v56 = vmul.f32 %v1018_v15, %v1016_v27  ;;  %v1026_v60 = vmul.f32 %v1025_v20, %v1016_v27  ;;  %v1218_v58 = vshll.u32 %v1753_v1, %v1212_v42  ;;  %v1221_v10 = vshll.u32 %v1754_v5, %v1212_v42 }
 0x172   :  { %v2491_v19 = vshrl.u32 %v1142_v33, 30  ;;  %v1222_v11 = vshrl.u32 %v1755_v9, %v2479_v24  ;;  %v1224_v14 = vshll.u32 %v1755_v9, %v1212_v42  ;;  %vm1034_vm2 = vcmp.lt.s32.totalorder %v2477_v23, 2 }
 0x173   :  { %v1020_v48 = vadd.f32 -0.4999988, %v1019_v56  ;;  %v1027_v6 = vadd.f32 -0.16666654, %v1026_v60  ;;  %v1227_v26 = vshll.u32 %v1756_v12, %v1212_v42  ;;  %vm1031_vm3 = vweird.f32 %v2148_v38 }
 0x174   :  { %v1144_v28 = vshll.u32 %v2491_v19, 30  ;;  %v2504_v0 = vor.u32 %v1216_v36, %v1215_v40  ;;  %v2506_v2 = vor.u32 %v1219_v35, %v1218_v58  ;;  %v1226_v7 = vor.u32 %v1225_v47, %v1224_v14 }
 0x175   :  { %v1021_v54 = vmul.f32 %v1020_v48, %v1016_v27  ;;  %v1028_v62 = vmul.f32 %v1027_v6, %v1016_v27  ;;  %v1228_v39 = vshrl.u32 %v1757_v16, %v2479_v24  ;;  %v309_v44 = vadd.f32 %v308_v59, %v243_v34  ;;  %v416_v48 = vpop.f32.mrf.mxu1 }
 0x176   :  { %v1145_v50 = vsub.s32 %v1141_v8, %v1144_v28  ;;  %v1223_v27 = vor.u32 %v1222_v11, %v1221_v10  ;;  %vm1230_vm4 = vcmp.lt.s32.totalorder %v2482_v49, 1  ;;  %vm1233_vm5 = vcmp.lt.s32.totalorder %v2482_v49, 4 }
 0x177   :  { %v1022_v31 = vadd.f32 1.0, %v1021_v54  ;;  %v1029_v41 = vadd.f32 1.0, %v1028_v62  ;;  %v1229_v30 = vor.u32 %v1228_v39, %v1227_v26  ;;  %v1666_v57 = vmul.f32 %v2248_v18, %v887_v51 }
 0x178   :  { %vm1146_vm6 = vcmp.lt.s32.totalorder %v1145_v50, 0  ;;  %v1147_v29 = vsub.s32 0, %v1145_v50  ;;  %v1238_v55 = vsel %vm1230_vm4, %v2504_v0, %v2506_v2  ;;  %v1239_v42 = vsel %vm1233_vm5, %v1226_v7, 920167782 }
 0x179   :  { %v1030_v43 = vmul.f32 %v1029_v41, %v2461_v22  ;;  %v1039_v61 = vxor.u32 2147483648, %v1022_v31  ;;  %v2520_v45 = vshll.u32 %v1206_v13, 8  ;;  %vm1232_vm7 = vcmp.lt.s32.totalorder %v2482_v49, 3 }
 0x17a   :  { %v1148_v15 = vsel %vm1146_vm6, %v1147_v29, %v1145_v50  ;;  %v366_v22 = vadd.f32 %v365_v4, %v309_v44  ;;  %vm1231_vm8 = vcmp.lt.s32.totalorder %v2482_v49, 2  ;;  %v1240_v51 = vsel %vm1232_vm7, %v1223_v27, %v1239_v42 }
 0x17b   :  { %v1036_v32 = vxor.u32 2147483648, %v1030_v43  ;;  %v1040_v20 = vsel %vm1038_vm0, %v1039_v61, %v1030_v43  ;;  %v1149_v8 = vclz %v1148_v15  ;;  %v1241_v56 = vsel %vm1231_vm8, %v1238_v55, %v1240_v51 }
 0x17c   :  { %v1242_v60 = vsel %vm1230_vm4, %v2506_v2, %v1223_v27  ;;  %v1243_v33 = vsel %vm1233_vm5, %v1229_v30, 1326507024  ;;  %v1137_v36 = vadd.s32 %v2456_v3, %v2448_v53  ;;  %v1247_v47 = vand.u32 65535, %v2520_v45 }
 0x17d   :  { %v1037_v34 = vsel %vm1035_vm1, %v1022_v31, %v1036_v32  ;;  %v1705_v35 = vadd.s32 4294967294, %v1149_v8  ;;  %v1244_v40 = vsel %vm1232_vm7, %v1226_v7, %v1243_v33  ;;  %v1248_v58 = vshrl.u32 %v2520_v45, 16 }
 0x17e   :  { %v1041_v13 = vsel %vm1034_vm2, %v1037_v34, %v1040_v20  ;;  %v1271_v10 = vand.u32 65535, %v1241_v56  ;;  %v1245_v23 = vsel %vm1231_vm8, %v1242_v60, %v1244_v40  ;;  %v1272_v53 = vshrl.u32 %v1241_v56, 16 }
 0x17f   :  { %v1042_v6 = vsel %vm1031_vm3, nan, %v1041_v13  ;;  %vm1706_vm9 = vcmp.lt.s32.totalorder %v1705_v35, 0  ;;  %v1249_v14 = vand.u32 65535, %v1245_v23  ;;  %v1250_v59 = vshrl.u32 %v1245_v23, 16 }
 0x180   :  { %v1667_v11 = vmul.f32 %v2248_v18, %v1042_v6  ;;  %v1152_v3 = vsel %vm1706_vm9, 0, %v1705_v35  ;;  %v2550_v54 = vadd.f32 %v416_v48, %v366_v22  ;;  %v1235_v26 = vsel %vm1233_vm5, %v1223_v27, 2102212464 }
 0x181   :  { %v1153_v62 = vsub.s32 32, %v1152_v3  ;;  %v1157_v28 = vsub.s32 4294967266, %v1152_v3  ;;  %v1154_v7 = vshll.u32 %v1145_v50, %v1152_v3  ;;  %v1214_v18 = vshrl.u32 %v1752_v63, %v2479_v24 }
 0x182   :  { %v1724_v38 = vpack.c.bf16 %v1667_v11, %v1666_v57  ;;  %v1252_v39 = vmul.u32 %v1250_v59, %v1247_v47  ;;  %v1253_v31 = vmul.u32 %v1249_v14, %v1248_v58  ;;  %v1274_v30 = vmul.u32 %v1272_v53, %v1247_v47 }
 0x183   :  { %v1155_v41 = vshrl.u32 %v1137_v36, %v1153_v62  ;;  %v1158_v44 = vadd.s32 127, %v1157_v28  ;;  %v1275_v4 = vmul.u32 %v1271_v10, %v1248_v58  ;;  %v1234_v43 = vsel %vm1230_vm4, %v1214_v18, %v2504_v0 }
 0x184   :  { %1736 = vst [vmem:[%s2850_s2 + $0x8] sm:$0xff] %v1724_v38   ;;  %v1236_v50 = vsel %vm1232_vm7, %v2506_v2, %v1235_v26  ;;  %v1251_v27 = vmul.u32 %v1249_v14, %v1247_v47  ;;  %v1255_v24 = vshll.u32 %v1252_v39, 16  ;;  %v1273_v57 = vmul.u32 %v1271_v10, %v1247_v47  ;;  %v247_v47 = vpop.f32.mrf.mxu2  ;;  %v314_v38 = vpop.f32.mrf.mxu3 }
 0x185   :  { %v1156_v61 = vor.u32 %v1155_v41, %v1154_v7  ;;  %v1159_v29 = vshll.u32 %v1158_v44, 23  ;;  %v1277_v55 = vshll.u32 %v1274_v30, 16  ;;  %v1254_v42 = vmul.u32 %v1250_v59, %v1248_v58 }
 0x186   :  { %v1257_v32 = vshll.u32 %v1253_v31, 16  ;;  %vm1259_vm10 = vc.u32 %v1251_v27, %v1255_v24  ;;  %v1261_v15 = vadd.s32 %v1255_v24, %v1251_v27  ;;  %v1276_v8 = vmul.u32 %v1272_v53, %v1248_v58 }
 0x187   :  { %v1160_v22 = vor.u32 4788187, %v1159_v29  ;;  %v1260_v20 = vsel %vm1259_vm10, 1, %v1758_v17  ;;  %v1279_v51 = vshll.u32 %v1275_v4, 16  ;;  %vm1281_vm12 = vc.u32 %v1273_v57, %v1277_v55 }
 0x188   :  { %v1262_v0 = vadd.s32 %v1260_v20, %v1254_v42  ;;  %vm1263_vm11 = vc.u32 %v1261_v15, %v1257_v32  ;;  %v1283_v34 = vadd.s32 %v1277_v55, %v1273_v57  ;;  %v1163_v56 = vcvt.s32.f32 %v1156_v61 }
 0x189   :  { %v1161_v2 = vand.u32 2147483647, %v1160_v22  ;;  %v1264_v60 = vsel %vm1263_vm11, 1, %v1758_v17  ;;  %v1282_v33 = vsel %vm1281_vm12, 1, %v1758_v17  ;;  %v1256_v13 = vshrl.u32 %v1252_v39, 16 }
 0x18a   :  { %v1266_v36 = vadd.s32 %v1264_v60, %v1262_v0  ;;  %v1284_v35 = vadd.s32 %v1282_v33, %v1276_v8  ;;  %vm1285_vm13 = vc.u32 %v1283_v34, %v1279_v51  ;;  %v1258_v6 = vshrl.u32 %v1253_v31, 16 }
 0x18b   :  { %v1164_v48 = vmul.f32 %v1163_v56, %v1161_v2  ;;  %v1278_v40 = vshrl.u32 %v1274_v30, 16  ;;  %v1286_v58 = vsel %vm1285_vm13, 1, %v1758_v17  ;;  %v1353_v23 = vand.u32 2147483647, %v2550_v54 }
 0x18c   :  { %v1267_v10 = vadd.s32 %v1266_v36, %v1256_v13  ;;  %v1288_v11 = vadd.s32 %v1286_v58, %v1284_v35  ;;  %v1356_v53 = vand.u32 2139095040, %v2550_v54  ;;  %vm1045_vm14 = vcmp.lt.s32.totalorder %v2298_v21, 0 }
 0x18d   :  { %v1165_v3 = vxor.u32 2147483648, %v1164_v48  ;;  %v1167_v14 = vsub.s32 4, %v2491_v19  ;;  %v248_v59 = vadd.f32 %v247_v47, %v1901_v25  ;;  %v1280_v28 = vshrl.u32 %v1275_v4, 16 }
 0x18e   :  { %v1268_v62 = vadd.s32 %v1267_v10, %v1258_v6  ;;  %v1289_v26 = vadd.s32 %v1288_v11, %v1278_v40  ;;  %v1357_v7 = vshrl.u32 %v1356_v53, 23  ;;  %vm2576_vm15 = vcmp.le.f32.partialorder %v1043_v46, 0.7853982 }
 0x18f   :  { %v1166_v39 = vsel %vm1045_vm14, %v1165_v3, %v1164_v48  ;;  %v1237_v31 = vsel %vm1231_vm8, %v1234_v43, %v1236_v50  ;;  %v1287_v41 = vadd.s32 %v1283_v34, %v1279_v51  ;;  %v1360_v30 = vand.u32 8388607, %v1353_v23  ;;  %v369_v43 = vpop.f32.mrf.mxu0  ;;  %v420_v51 = vpop.f32.mrf.mxu1 }
 0x190   :  { %v2587_v25 = vsel %vm2576_vm15, %v2298_v21, %v1166_v39  ;;  %v1290_v44 = vadd.s32 %v1289_v26, %v1280_v28  ;;  %v315_v46 = vadd.f32 %v314_v38, %v248_v59  ;;  %v1168_v4 = vsel %vm1045_vm14, %v1167_v14, %v2491_v19 }
 0x191   :  { %v1171_v27 = vmul.f32 %v2587_v25, %v2587_v25  ;;  %vm1293_vm0 = vc.u32 %v1268_v62, %v1287_v41  ;;  %v1710_v49 = vadd.s32 4294967169, %v1357_v7  ;;  %v1291_v29 = vmul.u32 %v2520_v45, %v1237_v31 }
 0x192   :  { %v1294_v50 = vadd.s32 1, %v1290_v44  ;;  %v1170_v55 = vsel %vm2576_vm15, 0, %v1168_v4  ;;  %v1361_v32 = vor.u32 8388608, %v1360_v30  ;;  %v370_v15 = vadd.f32 %v369_v43, %v315_v46 }
 0x193   :  { %v1172_v24 = vmul.f32 -0.001358992, %v1171_v27  ;;  %v1179_v61 = vmul.f32 -0.00019511016, %v1171_v27  ;;  %v1363_v57 = vadd.s32 1, %v1710_v49  ;;  %v1187_v56 = vadd.s32 3, %v1170_v55 }
 0x194   :  { %v1295_v42 = vsel %vm1293_vm0, %v1294_v50, %v1290_v44  ;;  %v2599_v33 = vshll.u32 %v1361_v32, 8  ;;  %v2601_v35 = vadd.f32 %v420_v51, %v370_v15  ;;  %vm1200_vm2 = vcmp.lt.s32.totalorder %v2395_v52, 0 }
 0x195   :  { %v1173_v22 = vadd.f32 0.041655596, %v1172_v24  ;;  %v1180_v19 = vadd.f32 0.008332121, %v1179_v61  ;;  %v1296_v20 = vadd.s32 %v1295_v42, %v1291_v29  ;;  %vm1364_vm1 = vcmp.gt.s32.totalorder %v1363_v57, 0 }
 0x196   :  { %v1365_v8 = vsel %vm1364_vm1, %v1363_v57, 0  ;;  %vm2606_vm3 = vcmp.le.f32.partialorder %v1198_v37, 0.7853982  ;;  %v2610_v11 = vand.u32 3, %v1187_v56  ;;  %v1292_v53 = vadd.s32 %v1287_v41, %v1268_v62 }
 0x197   :  { %v1174_v0 = vmul.f32 %v1173_v22, %v1171_v27  ;;  %v1181_v34 = vmul.f32 %v1180_v19, %v1171_v27  ;;  %v1297_v2 = vadd.s32 536870912, %v1296_v20  ;;  %v1367_v60 = vand.u32 31, %v1365_v8 }
 0x198   :  { %v2613_v3 = vand.u32 65535, %v2599_v33  ;;  %v2615_v59 = vshrl.u32 %v1365_v8, 5  ;;  %v1508_v38 = vand.u32 2147483647, %v2601_v35  ;;  %v1511_v28 = vand.u32 2139095040, %v2601_v35 }
 0x199   :  { %v1175_v45 = vadd.f32 -0.4999988, %v1174_v0  ;;  %v1182_v13 = vadd.f32 -0.16666654, %v1181_v34  ;;  %v1298_v36 = vshrl.u32 %v1297_v2, 30  ;;  %v1368_v47 = vsub.s32 32, %v1367_v60 }
 0x19a   :  { %v1370_v39 = vshll.u32 %v1752_v63, %v1367_v60  ;;  %v1373_v31 = vshll.u32 %v1753_v1, %v1367_v60  ;;  %v1376_v44 = vshll.u32 %v1754_v5, %v1367_v60  ;;  %v1379_v49 = vshll.u32 %v1755_v9, %v1367_v60 }
 0x19b   :  { %v1183_v48 = vmul.f32 %v1182_v13, %v1171_v27  ;;  %v1299_v40 = vshll.u32 %v1298_v36, 30  ;;  %v1322_v58 = vsub.s32 4, %v1298_v36  ;;  %v1176_v10 = vmul.f32 %v1175_v45, %v1171_v27 }
 0x19c   :  { %v1371_v7 = vshrl.u32 %v1753_v1, %v1368_v47  ;;  %v1374_v18 = vshrl.u32 %v1754_v5, %v1368_v47  ;;  %v1377_v30 = vshrl.u32 %v1755_v9, %v1368_v47  ;;  %v1380_v46 = vshrl.u32 %v1756_v12, %v1368_v47 }
 0x19d   :  { %v1300_v14 = vsub.s32 %v1296_v20, %v1299_v40  ;;  %v1184_v37 = vadd.f32 1.0, %v1183_v48  ;;  %v1323_v26 = vsel %vm1200_vm2, %v1322_v58, %v1298_v36  ;;  %v2625_v41 = vadd.f32 1.0, %v1176_v10 }
 0x19e   :  { %v1325_v27 = vsel %vm2606_vm3, 0, %v1323_v26  ;;  %v1383_v43 = vshrl.u32 %v1757_v16, %v1368_v47  ;;  %vm1193_vm5 = vcmp.eq.s32.totalorder %v2610_v11, 2  ;;  %v1372_v61 = vor.u32 %v1371_v7, %v1370_v39 }
 0x19f   :  { %vm1301_vm4 = vcmp.lt.s32.totalorder %v1300_v14, 0  ;;  %v1302_v62 = vsub.s32 0, %v1300_v14  ;;  %v2635_v50 = vmul.f32 %v1184_v37, %v2587_v25  ;;  %v1375_v29 = vor.u32 %v1374_v18, %v1373_v31 }
 0x1a0   :  { %v1381_v57 = vor.u32 %v1380_v46, %v1379_v49  ;;  %v1382_v55 = vshll.u32 %v1756_v12, %v1367_v60  ;;  %v1403_v42 = vshrl.u32 %v2599_v33, 16  ;;  %v1512_v32 = vshrl.u32 %v1511_v28, 23 }
 0x1a1   :  { %v1303_v4 = vsel %vm1301_vm4, %v1302_v62, %v1300_v14  ;;  %v1378_v22 = vor.u32 %v1377_v30, %v1376_v44  ;;  %vm1385_vm6 = vcmp.lt.s32.totalorder %v2615_v59, 1  ;;  %v2643_v19 = vand.u32 8388607, %v1508_v38 }
 0x1a2   :  { %v1304_v24 = vclz %v1303_v4  ;;  %v1194_v25 = vxor.u32 2147483648, %v2625_v41  ;;  %v1342_v20 = vadd.s32 3, %v1325_v27  ;;  %v1369_v8 = vshrl.u32 %v1752_v63, %v1368_v47 }
 0x1a3   :  { %v1384_v51 = vor.u32 %v1383_v43, %v1382_v55  ;;  %v1191_v0 = vxor.u32 2147483648, %v2635_v50  ;;  %vm1388_vm8 = vcmp.lt.s32.totalorder %v2615_v59, 4  ;;  %v1393_v34 = vsel %vm1385_vm6, %v1372_v61, %v1375_v29 }
 0x1a4   :  { %v1708_v15 = vadd.s32 4294967294, %v1304_v24  ;;  %vm1386_vm9 = vcmp.lt.s32.totalorder %v2615_v59, 2  ;;  %vm1387_vm10 = vcmp.lt.s32.totalorder %v2615_v59, 3  ;;  %v1394_v56 = vsel %vm1388_vm8, %v1381_v57, 920167782 }
 0x1a5   :  { %v1395_v13 = vsel %vm1387_vm10, %v1378_v22, %v1394_v56  ;;  %v1397_v36 = vsel %vm1385_vm6, %v1375_v29, %v1378_v22  ;;  %v1398_v40 = vsel %vm1388_vm8, %v1384_v51, 1326507024  ;;  %v1713_v58 = vadd.s32 4294967169, %v1512_v32 }
 0x1a6   :  { %vm1709_vm7 = vcmp.lt.s32.totalorder %v1708_v15, 0  ;;  %v1396_v48 = vsel %vm1386_vm9, %v1393_v34, %v1395_v13  ;;  %v1399_v37 = vsel %vm1387_vm10, %v1381_v57, %v1398_v40  ;;  %v2668_v7 = vsel %vm1193_vm5, %v1194_v25, %v2635_v50 }
 0x1a7   :  { %v1307_v2 = vsel %vm1709_vm7, 0, %v1708_v15  ;;  %v1426_v26 = vand.u32 65535, %v1396_v48  ;;  %v1400_v18 = vsel %vm1386_vm9, %v1397_v36, %v1399_v37  ;;  %v1427_v62 = vshrl.u32 %v1396_v48, 16 }
 0x1a8   :  { %v1308_v60 = vsub.s32 32, %v1307_v2  ;;  %v1312_v45 = vsub.s32 4294967266, %v1307_v2  ;;  %v1309_v47 = vshll.u32 %v1300_v14, %v1307_v2  ;;  %v1390_v14 = vsel %vm1388_vm8, %v1378_v22, 2102212464 }
 0x1a9   :  { %v1405_v44 = vshrl.u32 %v1400_v18, 16  ;;  %v2674_v30 = vand.u32 3, %v1342_v20  ;;  %v1389_v46 = vsel %vm1385_vm6, %v1369_v8, %v1372_v61  ;;  %v1429_v4 = vmul.u32 %v1427_v62, %v2613_v3 }
 0x1aa   :  { %v1310_v10 = vshrl.u32 %v1292_v53, %v1308_v60  ;;  %v1313_v28 = vadd.s32 127, %v1312_v45  ;;  %v1404_v53 = vand.u32 65535, %v1400_v18  ;;  %v1430_v27 = vmul.u32 %v1426_v26, %v1403_v42 }
 0x1ab   :  { %vm1190_vm11 = vcmp.eq.s32.totalorder %v2610_v11, 0  ;;  %v1391_v43 = vsel %vm1387_vm10, %v1375_v29, %v1390_v14  ;;  %v1407_v24 = vmul.u32 %v1405_v44, %v2613_v3  ;;  %v1518_v57 = vadd.s32 1, %v1713_v58 }
 0x1ac   :  { %v1311_v39 = vor.u32 %v1310_v10, %v1309_v47  ;;  %v1314_v31 = vshll.u32 %v1313_v28, 23  ;;  %v1408_v55 = vmul.u32 %v1404_v53, %v1403_v42  ;;  %v1428_v32 = vmul.u32 %v1426_v26, %v2613_v3 }
 0x1ad   :  { %v1431_v15 = vmul.u32 %v1427_v62, %v1403_v42  ;;  %v1432_v22 = vshll.u32 %v1429_v4, 16  ;;  %v1406_v61 = vmul.u32 %v1404_v53, %v2613_v3  ;;  %v1410_v8 = vshll.u32 %v1407_v24, 16 }
 0x1ae   :  { %v1315_v49 = vor.u32 4788187, %v1314_v31  ;;  %v1318_v20 = vcvt.s32.f32 %v1311_v39  ;;  %v1409_v51 = vmul.u32 %v1405_v44, %v1403_v42  ;;  %v1412_v34 = vshll.u32 %v1408_v55, 16 }
 0x1af   :  { %v1434_v2 = vshll.u32 %v1430_v27, 16  ;;  %vm1436_vm12 = vc.u32 %v1428_v32, %v1432_v22  ;;  %vm1414_vm13 = vc.u32 %v1406_v61, %v1410_v8  ;;  %v1416_v29 = vadd.s32 %v1410_v8, %v1406_v61 }
 0x1b0   :  { %v1316_v25 = vand.u32 2147483647, %v1315_v49  ;;  %v1437_v60 = vsel %vm1436_vm12, 1, %v1758_v17  ;;  %v1415_v45 = vsel %vm1414_vm13, 1, %v1758_v17  ;;  %v1438_v13 = vadd.s32 %v1432_v22, %v1428_v32 }
 0x1b1   :  { %v1439_v36 = vadd.s32 %v1437_v60, %v1431_v15  ;;  %vm1519_vm14 = vcmp.gt.s32.totalorder %v1518_v57, 0  ;;  %v1417_v48 = vadd.s32 %v1415_v45, %v1409_v51  ;;  %vm1418_vm15 = vc.u32 %v1416_v29, %v1412_v34 }
 0x1b2   :  { %v1319_v56 = vmul.f32 %v1318_v20, %v1316_v25  ;;  %v1520_v40 = vsel %vm1519_vm14, %v1518_v57, 0  ;;  %v1392_v3 = vsel %vm1386_vm9, %v1389_v46, %v1391_v43  ;;  %v1411_v42 = vshrl.u32 %v1407_v24, 16 }
 0x1b3   :  { %v1419_v58 = vsel %vm1418_vm15, 1, %v1758_v17  ;;  %vm1440_vm0 = vc.u32 %v1438_v13, %v1434_v2  ;;  %v1522_v26 = vand.u32 31, %v1520_v40  ;;  %v1192_v14 = vsel %vm1190_vm11, %v2625_v41, %v1191_v0 }
 0x1b4   :  { %v1320_v47 = vxor.u32 2147483648, %v1319_v56  ;;  %v1421_v28 = vadd.s32 %v1419_v58, %v1417_v48  ;;  %v1441_v37 = vsel %vm1440_vm0, 1, %v1758_v17  ;;  %v1433_v18 = vshrl.u32 %v1429_v4, 16 }
 0x1b5   :  { %v1443_v62 = vadd.s32 %v1441_v37, %v1439_v36  ;;  %vm1189_vm1 = vcmp.lt.s32.totalorder %v2610_v11, 2  ;;  %v1413_v31 = vshrl.u32 %v1408_v55, 16  ;;  %v2702_v44 = vsub.s32 32, %v1522_v26 }
 0x1b6   :  { %v1321_v10 = vsel %vm1200_vm2, %v1320_v47, %v1319_v56  ;;  %v1422_v53 = vadd.s32 %v1421_v28, %v1411_v42  ;;  %v1435_v46 = vshrl.u32 %v1430_v27, 16  ;;  %v2704_v49 = vadd.s32 %v1438_v13, %v1434_v2 }
 0x1b7   :  { %v1324_v59 = vsel %vm2606_vm3, %v2395_v52, %v1321_v10  ;;  %v1444_v50 = vadd.s32 %v1443_v62, %v1433_v18  ;;  %v1446_v43 = vmul.u32 %v2599_v33, %v1392_v3  ;;  %v2709_v6 = vshrl.u32 %v1520_v40, 5 }
 0x1b8   :  { %v1326_v39 = vmul.f32 %v1324_v59, %v1324_v59  ;;  %v2707_v24 = vadd.s32 %v1422_v53, %v1413_v31  ;;  %v1525_v57 = vshll.u32 %v1752_v63, %v1522_v26  ;;  %v1529_v55 = vshrl.u32 %v1754_v5, %v2702_v44 }
 0x1b9   :  { %v1445_v4 = vadd.s32 %v1444_v50, %v1435_v46  ;;  %v1532_v27 = vshrl.u32 %v1755_v9, %v2702_v44  ;;  %v1528_v33 = vshll.u32 %v1753_v1, %v1522_v26  ;;  %v1526_v25 = vshrl.u32 %v1753_v1, %v2702_v44 }
 0x1ba   :  { %v1327_v41 = vmul.f32 -0.001358992, %v1326_v39  ;;  %v1334_v0 = vmul.f32 -0.00019511016, %v1326_v39  ;;  %vm1448_vm2 = vc.u32 %v2707_v24, %v2704_v49  ;;  %v1531_v20 = vshll.u32 %v1754_v5, %v1522_v26 }
 0x1bb   :  { %v1449_v22 = vadd.s32 1, %v1445_v4  ;;  %v1534_v61 = vshll.u32 %v1755_v9, %v1522_v26  ;;  %vm1186_vm3 = vweird.f32 %v2298_v21  ;;  %v2724_v34 = vor.u32 %v1529_v55, %v1528_v33 }
 0x1bc   :  { %v1328_v32 = vadd.f32 0.041655596, %v1327_v41  ;;  %v1335_v15 = vadd.f32 0.008332121, %v1334_v0  ;;  %v1535_v2 = vshrl.u32 %v1756_v12, %v2702_v44  ;;  %v2728_v29 = vor.u32 %v1532_v27, %v1531_v20  ;;  %v2780_v27 = vld [vmem:[%s2848_s1 + $0x10] ss:$0 sm:$0xff] }
 0x1bd   :  { %v1450_v56 = vsel %vm1448_vm2, %v1449_v22, %v1445_v4  ;;  %v1537_v60 = vshll.u32 %v1756_v12, %v1522_v26  ;;  %v1538_v1 = vshrl.u32 %v1757_v16, %v2702_v44  ;;  %v1196_v36 = vsel %vm1189_vm1, %v1192_v14, %v2668_v7 }
 0x1be   :  { %v1329_v8 = vmul.f32 %v1328_v32, %v1326_v39  ;;  %v1336_v51 = vmul.f32 %v1335_v15, %v1326_v39  ;;  %v1451_v9 = vadd.s32 %v1450_v56, %v1446_v43  ;;  %v1536_v13 = vor.u32 %v1535_v2, %v1534_v61 }
 0x1bf   :  { %v1516_v47 = vor.u32 8388608, %v2643_v19  ;;  %v2737_v48 = vor.u32 %v1526_v25, %v1525_v57  ;;  %v1539_v40 = vor.u32 %v1538_v1, %v1537_v60  ;;  %vm1543_vm4 = vcmp.lt.s32.totalorder %v2709_v6, 4 }
 0x1c0   :  { %v1330_v5 = vadd.f32 -0.4999988, %v1329_v8  ;;  %v1337_v45 = vadd.f32 -0.16666654, %v1336_v51  ;;  %v1452_v58 = vadd.s32 536870912, %v1451_v9  ;;  %vm1341_vm5 = vweird.f32 %v2395_v52 }
 0x1c1   :  { %vm1540_vm6 = vcmp.lt.s32.totalorder %v2709_v6, 1  ;;  %vm1542_vm7 = vcmp.lt.s32.totalorder %v2709_v6, 3  ;;  %v1549_v12 = vsel %vm1543_vm4, %v1536_v13, 920167782  ;;  %v1553_v16 = vsel %vm1543_vm4, %v1539_v40, 1326507024 }
 0x1c2   :  { %v1331_v3 = vmul.f32 %v1330_v5, %v1326_v39  ;;  %v1338_v42 = vmul.f32 %v1337_v45, %v1326_v39  ;;  %v2747_v7 = vshrl.u32 %v1452_v58, 30  ;;  %v1552_v10 = vsel %vm1540_vm6, %v2724_v34, %v2728_v29 }
 0x1c3   :  { %v1548_v28 = vsel %vm1540_vm6, %v2737_v48, %v2724_v34  ;;  %v1550_v37 = vsel %vm1542_vm7, %v2728_v29, %v1549_v12  ;;  %v1554_v26 = vsel %vm1542_vm7, %v1536_v13, %v1553_v16  ;;  %v2762_v14 = vshll.u32 %v1516_v47, 8 }
 0x1c4   :  { %v1332_v11 = vadd.f32 1.0, %v1331_v3  ;;  %v1339_v19 = vadd.f32 1.0, %v1338_v42  ;;  %v1454_v39 = vshll.u32 %v2747_v7, 30  ;;  %vm1541_vm8 = vcmp.lt.s32.totalorder %v2709_v6, 2 }
 0x1c5   :  { %v1197_v31 = vsel %vm1186_vm3, nan, %v1196_v36  ;;  %vm1344_vm9 = vcmp.lt.s32.totalorder %v2674_v30, 2  ;;  %vm1345_vm10 = vcmp.eq.s32.totalorder %v2674_v30, 0  ;;  %v1555_v53 = vsel %vm1541_vm8, %v1552_v10, %v1554_v26 }
 0x1c6   :  { %v1340_v18 = vmul.f32 %v1339_v19, %v1324_v59  ;;  %v1349_v62 = vxor.u32 2147483648, %v1332_v11  ;;  %vm1348_vm11 = vcmp.eq.s32.totalorder %v2674_v30, 2  ;;  %v1455_v50 = vsub.s32 %v1451_v9, %v1454_v39 }
 0x1c7   :  { %v1551_v59 = vsel %vm1541_vm8, %v1548_v28, %v1550_v37  ;;  %v1557_v43 = vand.u32 65535, %v2762_v14  ;;  %v1558_v41 = vshrl.u32 %v2762_v14, 16  ;;  %v1559_v21 = vand.u32 65535, %v1555_v53 }
 0x1c8   :  { %v1346_v46 = vxor.u32 2147483648, %v1340_v18  ;;  %v1560_v0 = vshrl.u32 %v1555_v53, 16  ;;  %v1350_v57 = vsel %vm1348_vm11, %v1349_v62, %v1340_v18  ;;  %vm1456_vm12 = vcmp.lt.s32.totalorder %v1455_v50, 0 }
 0x1c9   :  { %v1457_v55 = vsub.s32 0, %v1455_v50  ;;  %v1668_v32 = vmul.f32 %v2780_v27, %v1197_v31  ;;  %v1581_v22 = vand.u32 65535, %v1551_v59  ;;  %v1563_v61 = vmul.u32 %v1559_v21, %v1558_v41 }
 0x1ca   :  { %v1347_v4 = vsel %vm1345_vm10, %v1332_v11, %v1346_v46  ;;  %v1562_v33 = vmul.u32 %v1560_v0, %v1557_v43  ;;  %v1582_v8 = vshrl.u32 %v1551_v59, 16  ;;  %v1561_v56 = vmul.u32 %v1559_v21, %v1557_v43 }
 0x1cb   :  { %v1351_v15 = vsel %vm1344_vm9, %v1347_v4, %v1350_v57  ;;  %v1458_v20 = vsel %vm1456_vm12, %v1457_v55, %v1455_v50  ;;  %v1564_v45 = vmul.u32 %v1560_v0, %v1558_v41  ;;  %v1567_v9 = vshll.u32 %v1563_v61, 16 }
 0x1cc   :  { %v1352_v25 = vsel %vm1341_vm5, nan, %v1351_v15  ;;  %v1459_v2 = vclz %v1458_v20  ;;  %v1565_v60 = vshll.u32 %v1562_v33, 16  ;;  %v1584_v36 = vmul.u32 %v1582_v8, %v1557_v43 }
 0x1cd   :  { %v1669_v51 = vmul.f32 %v2780_v27, %v1352_v25  ;;  %v1447_v52 = vadd.s32 %v2704_v49, %v2707_v24  ;;  %v1585_v40 = vmul.u32 %v1581_v22, %v1558_v41  ;;  %v1583_v42 = vmul.u32 %v1581_v22, %v1557_v43 }
 0x1ce   :  { %v1711_v5 = vadd.s32 4294967294, %v1459_v2  ;;  %vm1569_vm13 = vc.u32 %v1561_v56, %v1565_v60  ;;  %v1571_v13 = vadd.s32 %v1565_v60, %v1561_v56  ;;  %v1587_v58 = vshll.u32 %v1584_v36, 16 }
 0x1cf   :  { %v1729_v1 = vpack.c.bf16 %v1669_v51, %v1668_v32  ;;  %v1570_v30 = vsel %vm1569_vm13, 1, %v1758_v17  ;;  %v1566_v11 = vshrl.u32 %v1562_v33, 16  ;;  %v1586_v28 = vmul.u32 %v1582_v8, %v1558_v41 }
 0x1d0   :  { %vm1712_vm14 = vcmp.lt.s32.totalorder %v1711_v5, 0  ;;  %v1572_v47 = vadd.s32 %v1570_v30, %v1564_v45  ;;  %vm1573_vm15 = vc.u32 %v1571_v13, %v1567_v9  ;;  %v1589_v37 = vshll.u32 %v1585_v40, 16 }
 0x1d1   :  { %1737 = vst [vmem:[%s2850_s2 + $0x10] sm:$0xff] %v1729_v1   ;;  %v1462_v3 = vsel %vm1712_vm14, 0, %v1711_v5  ;;  %v1574_v19 = vsel %vm1573_vm15, 1, %v1758_v17  ;;  %vm1591_vm0 = vc.u32 %v1583_v42, %v1587_v58  ;;  %v1593_v24 = vadd.s32 %v1587_v58, %v1583_v42 }
 0x1d2   :  { %v1463_v12 = vsub.s32 32, %v1462_v3  ;;  %v1467_v16 = vsub.s32 4294967266, %v1462_v3  ;;  %v1576_v10 = vadd.s32 %v1574_v19, %v1572_v47  ;;  %v1592_v49 = vsel %vm1591_vm0, 1, %v1758_v17 }
 0x1d3   :  { %v1594_v39 = vadd.s32 %v1592_v49, %v1586_v28  ;;  %v1464_v31 = vshll.u32 %v1455_v50, %v1462_v3  ;;  %v1545_v46 = vsel %vm1543_vm4, %v2728_v29, 2102212464  ;;  %vm1595_vm1 = vc.u32 %v1593_v24, %v1589_v37 }
 0x1d4   :  { %v1465_v26 = vshrl.u32 %v1447_v52, %v1463_v12  ;;  %v1468_v18 = vadd.s32 127, %v1467_v16  ;;  %v1577_v62 = vadd.s32 %v1576_v10, %v1566_v11  ;;  %v1524_v59 = vshrl.u32 %v1752_v63, %v2702_v44 }
 0x1d5   :  { %v1568_v43 = vshrl.u32 %v1563_v61, 16  ;;  %v1596_v41 = vsel %vm1595_vm1, 1, %v1758_v17  ;;  %v1588_v4 = vshrl.u32 %v1584_v36, 16  ;;  %v1546_v55 = vsel %vm1542_vm7, %v2724_v34, %v1545_v46 }
 0x1d6   :  { %v1469_v53 = vshll.u32 %v1468_v18, 23  ;;  %v1466_v21 = vor.u32 %v1465_v26, %v1464_v31  ;;  %v1598_v57 = vadd.s32 %v1596_v41, %v1594_v39  ;;  %v1544_v50 = vsel %vm1540_vm6, %v1524_v59, %v2737_v48 }
 0x1d7   :  { %v1578_v29 = vadd.s32 %v1577_v62, %v1568_v43  ;;  %v1590_v15 = vshrl.u32 %v1585_v40, 16  ;;  %v1597_v63 = vadd.s32 %v1593_v24, %v1589_v37  ;;  %v1547_v17 = vsel %vm1541_vm8, %v1544_v50, %v1546_v55 }
 0x1d8   :  { %v1470_v0 = vor.u32 4788187, %v1469_v53  ;;  %v1599_v33 = vadd.s32 %v1598_v57, %v1588_v4  ;;  %v1473_v44 = vcvt.s32.f32 %v1466_v21  ;;  %v1601_v61 = vmul.u32 %v2762_v14, %v1547_v17 }
 0x1d9   :  { %vm1603_vm2 = vc.u32 %v1578_v29, %v1597_v63  ;;  %vm1355_vm3 = vcmp.lt.s32.totalorder %v2550_v54, 0  ;;  %vm2816_vm4 = vcmp.le.f32.partialorder %v1353_v23, 0.7853982  ;;  %v1602_v40 = vadd.s32 %v1597_v63, %v1578_v29 }
 0x1da   :  { %v1471_v32 = vand.u32 2147483647, %v1470_v0  ;;  %v1600_v22 = vadd.s32 %v1599_v33, %v1590_v15  ;;  %v1477_v24 = vsub.s32 4, %v2747_v7  ;;  %vm1510_vm7 = vcmp.lt.s32.totalorder %v2601_v35, 0 }
 0x1db   :  { %vm2830_vm8 = vcmp.le.f32.partialorder %v1508_v38, 0.7853982  ;;  %vm1496_vm12 = vweird.f32 %v2550_v54  ;;  %vm1651_vm0 = vweird.f32 %v2601_v35 }
 0x1dc   :  { %v1474_v25 = vmul.f32 %v1473_v44, %v1471_v32  ;;  %v1604_v20 = vadd.s32 1, %v1600_v22  ;;  %v1478_v46 = vsel %vm1355_vm3, %v1477_v24, %v2747_v7 }
 0x1dd   :  { %v1480_v4 = vsel %vm2816_vm4, 0, %v1478_v46 }
 0x1de   :  { %v1605_v48 = vsel %vm1603_vm2, %v1604_v20, %v1600_v22  ;;  %v1475_v51 = vxor.u32 2147483648, %v1474_v25  ;;  %v1497_v32 = vadd.s32 3, %v1480_v4 }
 0x1df   :  { %v1606_v8 = vadd.s32 %v1605_v48, %v1601_v61 }
 0x1e0   :  { %v1476_v56 = vsel %vm1355_vm3, %v1475_v51, %v1474_v25  ;;  %v1498_v20 = vand.u32 3, %v1497_v32 }
 0x1e1   :  { %v1607_v2 = vadd.s32 536870912, %v1606_v8  ;;  %v1479_v14 = vsel %vm2816_vm4, %v2550_v54, %v1476_v56 }
 0x1e2   :  { %v1481_v45 = vmul.f32 %v1479_v14, %v1479_v14  ;;  %vm1500_vm9 = vcmp.eq.s32.totalorder %v1498_v20, 0  ;;  %vm1503_vm10 = vcmp.eq.s32.totalorder %v1498_v20, 2  ;;  %vm1499_vm11 = vcmp.lt.s32.totalorder %v1498_v20, 2 }
 0x1e3   :  { %v1608_v34 = vshrl.u32 %v1607_v2, 30 }
 0x1e4   :  { %v1489_v13 = vmul.f32 -0.00019511016, %v1481_v45  ;;  %v1482_v42 = vmul.f32 -0.001358992, %v1481_v45 }
 0x1e5   :  { %v1609_v60 = vshll.u32 %v1608_v34, 30  ;;  %v1632_v21 = vsub.s32 4, %v1608_v34 }
 0x1e6   :  { %v1490_v47 = vadd.f32 0.008332121, %v1489_v13  ;;  %v1483_v28 = vadd.f32 0.041655596, %v1482_v42 }
 0x1e7   :  { %v1610_v1 = vsub.s32 %v1606_v8, %v1609_v60  ;;  %v1633_v15 = vsel %vm1510_vm7, %v1632_v21, %v1608_v34 }
 0x1e8   :  { %v1491_v11 = vmul.f32 %v1490_v47, %v1481_v45  ;;  %v1484_v62 = vmul.f32 %v1483_v28, %v1481_v45  ;;  %v1635_v17 = vsel %vm2830_vm8, 0, %v1633_v15 }
 0x1e9   :  { %vm1611_vm5 = vcmp.lt.s32.totalorder %v1610_v1, 0  ;;  %v1612_v5 = vsub.s32 0, %v1610_v1  ;;  %v1652_v51 = vadd.s32 3, %v1635_v17 }
 0x1ea   :  { %v1492_v26 = vadd.f32 -0.16666654, %v1491_v11  ;;  %v1485_v59 = vadd.f32 -0.4999988, %v1484_v62 }
 0x1eb   :  { %v1613_v9 = vsel %vm1611_vm5, %v1612_v5, %v1610_v1 }
 0x1ec   :  { %v1614_v30 = vclz %v1613_v9  ;;  %v1493_v31 = vmul.f32 %v1492_v26, %v1481_v45  ;;  %v1486_v50 = vmul.f32 %v1485_v59, %v1481_v45 }
 0x1ee   :  { %v1714_v36 = vadd.s32 4294967294, %v1614_v30  ;;  %v1494_v57 = vadd.f32 1.0, %v1493_v31  ;;  %v1487_v44 = vadd.f32 1.0, %v1486_v50 }
 0x1f0   :  { %vm1715_vm6 = vcmp.lt.s32.totalorder %v1714_v36, 0  ;;  %v1495_v38 = vmul.f32 %v1494_v57, %v1479_v14  ;;  %v1504_v2 = vxor.u32 2147483648, %v1487_v44 }
 0x1f1   :  { %v1617_v52 = vsel %vm1715_vm6, 0, %v1714_v36 }
 0x1f2   :  { %v1618_v23 = vsub.s32 32, %v1617_v52  ;;  %v1622_v3 = vsub.s32 4294967266, %v1617_v52  ;;  %v1619_v58 = vshll.u32 %v1610_v1, %v1617_v52  ;;  %v1501_v61 = vxor.u32 2147483648, %v1495_v38 }
 0x1f3   :  { %v1653_v1 = vand.u32 3, %v1652_v51  ;;  %v1505_v5 = vsel %vm1503_vm10, %v1504_v2, %v1495_v38 }
 0x1f4   :  { %v1620_v12 = vshrl.u32 %v1602_v40, %v1618_v23  ;;  %v1623_v16 = vadd.s32 127, %v1622_v3  ;;  %v1502_v6 = vsel %vm1500_vm9, %v1487_v44, %v1501_v61 }
 0x1f5   :  { %v1506_v30 = vsel %vm1499_vm11, %v1502_v6, %v1505_v5  ;;  %vm1655_vm13 = vcmp.eq.s32.totalorder %v1653_v1, 0  ;;  %vm1658_vm14 = vcmp.eq.s32.totalorder %v1653_v1, 2  ;;  %vm1654_vm15 = vcmp.lt.s32.totalorder %v1653_v1, 2 }
 0x1f6   :  { %v1621_v19 = vor.u32 %v1620_v12, %v1619_v58  ;;  %v1624_v10 = vshll.u32 %v1623_v16, 23  ;;  %v1507_v36 = vsel %vm1496_vm12, nan, %v1506_v30 }
 0x1f7   :  { %v1670_v3 = vmul.f32 %v2780_v27, %v1507_v36 }
 0x1f8   :  { %v1625_v37 = vor.u32 4788187, %v1624_v10  ;;  %v1628_v49 = vcvt.s32.f32 %v1621_v19 }
 0x1fa   :  { %v1626_v18 = vand.u32 2147483647, %v1625_v37 }
 0x1fc   :  { %v1629_v39 = vmul.f32 %v1628_v49, %v1626_v18 }
 0x1fe   :  { %v1630_v53 = vxor.u32 2147483648, %v1629_v39 }
 0x200   :  { %v1631_v41 = vsel %vm1510_vm7, %v1630_v53, %v1629_v39 }
 0x201   :  { %v1634_v0 = vsel %vm2830_vm8, %v2601_v35, %v1631_v41 }
 0x202   :  { %v1636_v7 = vmul.f32 %v1634_v0, %v1634_v0 }
 0x204   :  { %v1637_v55 = vmul.f32 -0.001358992, %v1636_v7  ;;  %v1644_v29 = vmul.f32 -0.00019511016, %v1636_v7 }
 0x206   :  { %v1638_v33 = vadd.f32 0.041655596, %v1637_v55  ;;  %v1645_v63 = vadd.f32 0.008332121, %v1644_v29 }
 0x208   :  { %v1639_v22 = vmul.f32 %v1638_v33, %v1636_v7  ;;  %v1646_v25 = vmul.f32 %v1645_v63, %v1636_v7 }
 0x20a   :  { %v1640_v48 = vadd.f32 -0.4999988, %v1639_v22  ;;  %v1647_v8 = vadd.f32 -0.16666654, %v1646_v25 }
 0x20c   :  { %v1641_v56 = vmul.f32 %v1640_v48, %v1636_v7  ;;  %v1648_v60 = vmul.f32 %v1647_v8, %v1636_v7 }
 0x20e   :  { %v1642_v34 = vadd.f32 1.0, %v1641_v56  ;;  %v1649_v14 = vadd.f32 1.0, %v1648_v60 }
 0x210   :  { %v1650_v45 = vmul.f32 %v1649_v14, %v1634_v0  ;;  %v1659_v9 = vxor.u32 2147483648, %v1642_v34 }
 0x212   :  { %v1656_v13 = vxor.u32 2147483648, %v1650_v45  ;;  %v1660_v47 = vsel %vm1658_vm14, %v1659_v9, %v1650_v45 }
 0x214   :  { %v1657_v52 = vsel %vm1655_vm13, %v1642_v34, %v1656_v13 }
 0x215   :  { %v1661_v40 = vsel %vm1654_vm15, %v1657_v52, %v1660_v47 }
 0x216   :  { %v1662_v23 = vsel %vm1651_vm0, nan, %v1661_v40 }
 0x217   :  { %v1671_v42 = vmul.f32 %v2780_v27, %v1662_v23 }
 0x219   :  { %v1734_v58 = vpack.c.bf16 %v1671_v42, %v1670_v3 }
 0x21b   :  { %1738 = vst [vmem:[%s2850_s2 + $0x18] sm:$0xff] %v1734_v58  }

</bundles_post_ra>
